<compile_context>
chip_gen: v5e
topology: v5e:2x2
jax: 0.10.0
libtpu: 0.0.40
codegen_flags: <defaults>
</compile_context>

<pallas_src>
import functools
import math

import jax
import jax.numpy as jnp
from jax import lax
from jax.experimental import pallas as pl
from jax.experimental.pallas import tpu as pltpu

LANE = 128
MXU_M = 128            # MXU M-granularity for the batch tile
UNROLL_LAYER_LIMIT = 8  # static unroll of hidden layers up to this count


def _round_up(x, m):
    return ((x + m - 1) // m) * m


def _const_index_map(ndim):
    def index_map(i):
        return (0,) * ndim
    return index_map


def _mlp_bc_kernel(x_ref, w_in_ref, b_in_ref, w_hid_ref, b_hid_ref,
                   w_out_ref, b_out_ref, o_ref, *, n_hidden_layers):
    """Fused MLP forward for one batch tile.

    x_ref:     (TILE_B, in_dim)           f32
    w_in_ref:  (in_dim, H_pad)  bf16      b_in_ref:  (1, H_pad)          f32
    w_hid_ref: (n_hidden, H_pad, H_pad)   bf16
    b_hid_ref: (n_hidden, 1, H_pad)       f32
    w_out_ref: (H_pad, out_pad) bf16      b_out_ref: (1, out_pad)        f32
    o_ref:     (TILE_B, out_pad) f32      (out_pad = round_up(max_length*act_dim, 128))
    """
    # layers[0]: Linear(max_length*state_dim, H) -- bf16 MXU operands, f32 accumulate.
    x = x_ref[...].astype(jnp.bfloat16)
    h = jnp.dot(x, w_in_ref[...], preferred_element_type=jnp.float32) + b_in_ref[...]

    # (n_layer - 1) x [ReLU, Dropout(identity in eval), Linear(H, H)]
    # TODO(synk): nn.Dropout training-mode masking (pltpu.prng_*) not reproduced;
    #             eval-mode identity semantics are implemented.
    def layer(l, h):
        h = jnp.maximum(h, 0.0)  # ReLU in f32 on the VPU
        return (jnp.dot(h.astype(jnp.bfloat16), w_hid_ref[l],
                        preferred_element_type=jnp.float32) + b_hid_ref[l])

    if n_hidden_layers <= UNROLL_LAYER_LIMIT:
        for l in range(n_hidden_layers):          # static unroll (small counts)
            h = layer(l, h)
    else:
        h = lax.fori_loop(0, n_hidden_layers, layer, h)  # bound code size

    # ReLU, Dropout(identity), Linear(H, out_pad), Sigmoid (f32 on EUP).
    h = jnp.maximum(h, 0.0)
    y = jnp.dot(h.astype(jnp.bfloat16), w_out_ref[...],
                preferred_element_type=jnp.float32) + b_out_ref[...]
    o_ref[...] = jax.nn.sigmoid(y).astype(o_ref.dtype)


def mlp_bc_forward(states, params, *, max_length, act_dim, tile_b=256):
    """Pallas wrapper reproducing MLPBCModel.forward (eval mode)."""
    w_in, b_in, w_hid, b_hid, w_out_p, b_out_p = params

    B = states.shape[0]
    # Keep x in f32 HBM; cast to bf16 in-kernel (wrapper-side cast = extra HBM pass).
    x = states.reshape(B, -1).astype(jnp.float32)      # (B, max_length*state_dim)
    in_dim = x.shape[1]
    H_pad = w_in.shape[1]                               # lane-dense padded hidden width
    out_dim = max_length * act_dim
    out_pad = w_out_p.shape[1]                          # lane-dense padded output width
    n_hidden = int(w_hid.shape[0])

    # Batch tile: MXU-M aligned (>= 128); capped so the grid has >= 2 steps whenever
    # the batch allows, so ("parallel",) shards the batch across v7x's two TCs.
    tile_b = _round_up(max(MXU_M, min(int(tile_b), _round_up(B, MXU_M))), MXU_M)
    if B > MXU_M:
        tile_b = min(tile_b, _round_up(-(-B // 2), MXU_M))
    B_pad = _round_up(B, tile_b)
    if B_pad != B:
        x = jnp.pad(x, ((0, B_pad - B), (0, 0)))
    grid = (B_pad // tile_b,)

    weight_arrays = (w_in, b_in, w_hid, b_hid, w_out_p, b_out_p)

    # Advisory cost estimate for XLA's scheduler.
    flops = 2 * B_pad * (in_dim * H_pad + n_hidden * H_pad * H_pad + H_pad * out_pad)
    bytes_accessed = (B_pad * in_dim * 4
                      + sum(int(a.size) * a.dtype.itemsize for a in weight_arrays)
                      + B_pad * out_pad * 4)
    cost = pl.CostEstimate(flops=flops,
                           transcendentals=B_pad * out_pad,   # sigmoid
                           bytes_accessed=bytes_accessed)

    # VMEM budget derived from actual block sizes (weights x buffer count,
    # double-buffered x/out tiles, live activation scratch), capped by device VMEM.
    weight_block_bytes = sum(int(a.size) * a.dtype.itemsize for a in weight_arrays)
    io_block_bytes = 2 * tile_b * in_dim * 4 + 2 * tile_b * out_pad * 4
    act_bytes = 6 * tile_b * H_pad * 4

    def _vmem_limit(weight_bufs):
        need = weight_bufs * weight_block_bytes + io_block_bytes + act_bytes + (4 << 20)
        try:
            cap = int(0.85 * pltpu.get_tpu_info().vmem_capacity_bytes)
        except Exception:
            cap = 64 << 20   # safe default on every generation (v7x physical = 64 MiB)
        cap = min(cap, 100 << 20)
        # TODO(synk): if `need` exceeds `cap` (very large H / n_layer), stream w_hid
        # per layer (layer grid axis / pltpu.emit_pipeline) instead of holding the
        # full weight stack resident.
        return min(max(need, 32 << 20), cap)

    kernel = functools.partial(_mlp_bc_kernel, n_hidden_layers=n_hidden)

    def build(single_buffer_weights):
        def wspec(arr):
            idx = _const_index_map(arr.ndim)
            if single_buffer_weights:
                # Grid-invariant block: one VMEM buffer is enough (index_map constant).
                return pl.BlockSpec(arr.shape, idx, pipeline_mode=pl.Buffered(1))
            return pl.BlockSpec(arr.shape, idx)

        return pl.pallas_call(
            kernel,
            out_shape=jax.ShapeDtypeStruct((B_pad, out_pad), jnp.float32),
            grid=grid,
            in_specs=[pl.BlockSpec((tile_b, in_dim), lambda i: (i, 0))]
                     + [wspec(a) for a in weight_arrays],
            out_specs=pl.BlockSpec((tile_b, out_pad), lambda i: (i, 0)),
            compiler_params=pltpu.CompilerParams(
                dimension_semantics=("parallel",),      # megacore batch split on v7x
                vmem_limit_bytes=_vmem_limit(1 if single_buffer_weights else 2)),
            cost_estimate=cost,
        )

    args = (x,) + weight_arrays
    try:
        y = build(True)(*args)
    except Exception:
        # pipeline_mode=pl.Buffered(1) unsupported on this jax/libtpu version:
        # fall back to default double-buffered weight blocks (still correct).
        y = build(False)(*args)

    return y[:B, :out_dim].reshape(B, max_length, act_dim)


def init_params(key, state_dim, act_dim, hidden_size, n_layer, max_length):
    """Parameter init mirroring torch.nn.Linear's U(-1/sqrt(fan_in), +) init.

    Weights stored as (in_features, out_features). The hidden width and the output
    width are zero-padded to multiples of 128 (lane-dense MXU tiles); padding is
    math-exact (zero weights/biases, ReLU(0)=0) and the padded output columns are
    sliced off in the wrapper. MXU operand weights are cast to bf16."""
    if n_layer < 2:
        raise ValueError("n_layer must be >= 2 for this setup")

    def linear(key, fan_in, fan_out):
        kw, kb = jax.random.split(key)
        bound = 1.0 / math.sqrt(fan_in)
        w = jax.random.uniform(kw, (fan_in, fan_out), jnp.float32, -bound, bound)
        b = jax.random.uniform(kb, (1, fan_out), jnp.float32, -bound, bound)
        return w, b

    in_dim = max_length * state_dim
    out_dim = max_length * act_dim
    H = hidden_size
    H_pad = _round_up(H, LANE)
    out_pad = _round_up(out_dim, LANE)
    n_hidden = n_layer - 1

    keys = jax.random.split(key, n_hidden + 2)

    w_in, b_in = linear(keys[0], in_dim, H)
    w_in_p = jnp.zeros((in_dim, H_pad), jnp.float32).at[:, :H].set(w_in)
    b_in_p = jnp.zeros((1, H_pad), jnp.float32).at[:, :H].set(b_in)

    hid_ws, hid_bs = [], []
    for i in range(n_hidden):
        w, b = linear(keys[1 + i], H, H)
        hid_ws.append(jnp.zeros((H_pad, H_pad), jnp.float32).at[:H, :H].set(w))
        hid_bs.append(jnp.zeros((1, H_pad), jnp.float32).at[:, :H].set(b))
    w_hid_p = jnp.stack(hid_ws)                     # (n_hidden, H_pad, H_pad)
    b_hid_p = jnp.stack(hid_bs)                     # (n_hidden, 1, H_pad)

    w_out, b_out = linear(keys[-1], H, out_dim)
    w_out_p = jnp.zeros((H_pad, out_pad), jnp.float32).at[:H, :out_dim].set(w_out)
    b_out_p = jnp.zeros((1, out_pad), jnp.float32).at[:, :out_dim].set(b_out)

    # MXU operands in bf16 (f32 accumulation in-kernel); biases stay f32.
    return (w_in_p.astype(jnp.bfloat16), b_in_p,
            w_hid_p.astype(jnp.bfloat16), b_hid_p,
            w_out_p.astype(jnp.bfloat16), b_out_p)


def _reference_forward(states, params, *, max_length, act_dim):
    """Plain-JAX reference with the same padded params / mixed precision as the kernel."""
    w_in, b_in, w_hid, b_hid, w_out_p, b_out_p = params
    B = states.shape[0]
    out_dim = max_length * act_dim
    x = states.reshape(B, -1).astype(jnp.float32)
    h = jnp.dot(x.astype(jnp.bfloat16), w_in, preferred_element_type=jnp.float32) + b_in
    for l in range(w_hid.shape[0]):
        h = jnp.maximum(h, 0.0)
        h = jnp.dot(h.astype(jnp.bfloat16), w_hid[l],
                    preferred_element_type=jnp.float32) + b_hid[l]
    h = jnp.maximum(h, 0.0)
    y = jax.nn.sigmoid(jnp.dot(h.astype(jnp.bfloat16), w_out_p,
                               preferred_element_type=jnp.float32) + b_out_p)
    return y[:, :out_dim].reshape(B, max_length, act_dim)


if __name__ == "__main__":
    # batch=256 with tile_b=128 gives grid=(2,): exercises the multi-step batch
    # pipeline and the v7x two-TensorCore split, with MXU-aligned (128) M tiles.
    batch = 256
    state_dim = 12
    act_dim = 6
    hidden_size = 32
    n_layer = 3
    max_length = 2

    key = jax.random.PRNGKey(0)
    k_params, k_states = jax.random.split(key)

    params = init_params(k_params, state_dim, act_dim, hidden_size, n_layer, max_length)
    states = jax.random.normal(k_states, (batch, max_length, state_dim), jnp.float32)

    actions = mlp_bc_forward(states, params, max_length=max_length, act_dim=act_dim,
                             tile_b=128)
    actions = jax.block_until_ready(actions)

    ref = _reference_forward(states, params, max_length=max_length, act_dim=act_dim)
    assert actions.shape == (batch, max_length, act_dim)
    max_err = float(jnp.max(jnp.abs(actions - ref)))
    assert max_err <= 2e-3, max_err

    print("KERNEL_OK")
</pallas_src>

<mosaic_0001>
module attributes {stable_mosaic.version = 11 : i64} {
  func.func @_mlp_bc_kernel(%arg0: i32, %arg1: memref<128x24xf32, #tpu.memory_space<vmem>>, %arg2: memref<24x128xbf16, #tpu.memory_space<vmem>>, %arg3: memref<1x128xf32, #tpu.memory_space<vmem>>, %arg4: memref<2x128x128xbf16, #tpu.memory_space<vmem>>, %arg5: memref<2x1x128xf32, #tpu.memory_space<vmem>>, %arg6: memref<128x128xbf16, #tpu.memory_space<vmem>>, %arg7: memref<1x128xf32, #tpu.memory_space<vmem>>, %arg8: memref<128x128xf32, #tpu.memory_space<vmem>>) attributes {dimension_semantics = [#tpu.dimension_semantics<parallel>], iteration_bounds = array<i64: 2>, scalar_prefetch = 0 : i64, scratch_operands = 0 : i64, tpu.core_type = #tpu.core_type<tc>, window_params = [{transform_indices = @transform_0, window_bounds = array<i64: 128, 24>}, {pipeline_mode = #tpu.pipeline_mode<synchronous>, transform_indices = @transform_1, window_bounds = array<i64: 24, 128>}, {pipeline_mode = #tpu.pipeline_mode<synchronous>, transform_indices = @transform_2, window_bounds = array<i64: 1, 128>}, {pipeline_mode = #tpu.pipeline_mode<synchronous>, transform_indices = @transform_3, window_bounds = array<i64: 2, 128, 128>}, {pipeline_mode = #tpu.pipeline_mode<synchronous>, transform_indices = @transform_4, window_bounds = array<i64: 2, 1, 128>}, {pipeline_mode = #tpu.pipeline_mode<synchronous>, transform_indices = @transform_5, window_bounds = array<i64: 128, 128>}, {pipeline_mode = #tpu.pipeline_mode<synchronous>, transform_indices = @transform_6, window_bounds = array<i64: 1, 128>}, {transform_indices = @transform_7, window_bounds = array<i64: 128, 128>}]} {
    %c0 = arith.constant 0 : index
    %c0_0 = arith.constant 0 : index
    %0 = vector.load %arg1[%c0, %c0_0] : memref<128x24xf32, #tpu.memory_space<vmem>>, vector<128x24xf32>
    %1 = arith.truncf %0 : vector<128x24xf32> to vector<128x24xbf16>
    %c0_1 = arith.constant 0 : index
    %c0_2 = arith.constant 0 : index
    %2 = vector.load %arg2[%c0_1, %c0_2] : memref<24x128xbf16, #tpu.memory_space<vmem>>, vector<24x128xbf16>
    %cst = arith.constant dense<0.000000e+00> : vector<128x128xf32>
    %3 = tpu.matmul %1, %2, %cst {dimension_numbers = #tpu.dot_dimension_numbers<[1], [0], [0], [1], [0, 0, 1, 1], [], []>} : vector<128x24xbf16>, vector<24x128xbf16>, vector<128x128xf32> -> vector<128x128xf32>
    %c0_3 = arith.constant 0 : index
    %c0_4 = arith.constant 0 : index
    %4 = vector.load %arg3[%c0_3, %c0_4] : memref<1x128xf32, #tpu.memory_space<vmem>>, vector<1x128xf32>
    %5 = vector.broadcast %4 : vector<1x128xf32> to vector<128x128xf32>
    %6 = arith.addf %3, %5 : vector<128x128xf32>
    %cst_5 = arith.constant 0.000000e+00 : f32
    %7 = vector.broadcast %cst_5 : f32 to vector<128x128xf32>
    %8 = arith.maximumf %6, %7 : vector<128x128xf32>
    %9 = arith.truncf %8 : vector<128x128xf32> to vector<128x128xbf16>
    %c0_6 = arith.constant 0 : index
    %c0_7 = arith.constant 0 : index
    %c0_8 = arith.constant 0 : index
    %10 = vector.load %arg4[%c0_6, %c0_7, %c0_8] : memref<2x128x128xbf16, #tpu.memory_space<vmem>>, vector<1x128x128xbf16>
    %11 = vector.shape_cast %10 : vector<1x128x128xbf16> to vector<128x128xbf16>
    %cst_9 = arith.constant dense<0.000000e+00> : vector<128x128xf32>
    %12 = tpu.matmul %9, %11, %cst_9 {dimension_numbers = #tpu.dot_dimension_numbers<[1], [0], [0], [1], [0, 0, 1, 1], [], []>} : vector<128x128xbf16>, vector<128x128xbf16>, vector<128x128xf32> -> vector<128x128xf32>
    %c0_10 = arith.constant 0 : index
    %c0_11 = arith.constant 0 : index
    %c0_12 = arith.constant 0 : index
    %13 = vector.load %arg5[%c0_10, %c0_11, %c0_12] : memref<2x1x128xf32, #tpu.memory_space<vmem>>, vector<1x1x128xf32>
    %14 = vector.shape_cast %13 : vector<1x1x128xf32> to vector<1x128xf32>
    %15 = vector.broadcast %14 : vector<1x128xf32> to vector<128x128xf32>
    %16 = arith.addf %12, %15 : vector<128x128xf32>
    %cst_13 = arith.constant 0.000000e+00 : f32
    %17 = vector.broadcast %cst_13 : f32 to vector<128x128xf32>
    %18 = arith.maximumf %16, %17 : vector<128x128xf32>
    %19 = arith.truncf %18 : vector<128x128xf32> to vector<128x128xbf16>
    %c1 = arith.constant 1 : index
    %c0_14 = arith.constant 0 : index
    %c0_15 = arith.constant 0 : index
    %20 = vector.load %arg4[%c1, %c0_14, %c0_15] : memref<2x128x128xbf16, #tpu.memory_space<vmem>>, vector<1x128x128xbf16>
    %21 = vector.shape_cast %20 : vector<1x128x128xbf16> to vector<128x128xbf16>
    %cst_16 = arith.constant dense<0.000000e+00> : vector<128x128xf32>
    %22 = tpu.matmul %19, %21, %cst_16 {dimension_numbers = #tpu.dot_dimension_numbers<[1], [0], [0], [1], [0, 0, 1, 1], [], []>} : vector<128x128xbf16>, vector<128x128xbf16>, vector<128x128xf32> -> vector<128x128xf32>
    %c1_17 = arith.constant 1 : index
    %c0_18 = arith.constant 0 : index
    %c0_19 = arith.constant 0 : index
    %23 = vector.load %arg5[%c1_17, %c0_18, %c0_19] : memref<2x1x128xf32, #tpu.memory_space<vmem>>, vector<1x1x128xf32>
    %24 = vector.shape_cast %23 : vector<1x1x128xf32> to vector<1x128xf32>
    %25 = vector.broadcast %24 : vector<1x128xf32> to vector<128x128xf32>
    %26 = arith.addf %22, %25 : vector<128x128xf32>
    %cst_20 = arith.constant 0.000000e+00 : f32
    %27 = vector.broadcast %cst_20 : f32 to vector<128x128xf32>
    %28 = arith.maximumf %26, %27 : vector<128x128xf32>
    %29 = arith.truncf %28 : vector<128x128xf32> to vector<128x128xbf16>
    %c0_21 = arith.constant 0 : index
    %c0_22 = arith.constant 0 : index
    %30 = vector.load %arg6[%c0_21, %c0_22] : memref<128x128xbf16, #tpu.memory_space<vmem>>, vector<128x128xbf16>
    %cst_23 = arith.constant dense<0.000000e+00> : vector<128x128xf32>
    %31 = tpu.matmul %29, %30, %cst_23 {dimension_numbers = #tpu.dot_dimension_numbers<[1], [0], [0], [1], [0, 0, 1, 1], [], []>} : vector<128x128xbf16>, vector<128x128xbf16>, vector<128x128xf32> -> vector<128x128xf32>
    %c0_24 = arith.constant 0 : index
    %c0_25 = arith.constant 0 : index
    %32 = vector.load %arg7[%c0_24, %c0_25] : memref<1x128xf32, #tpu.memory_space<vmem>>, vector<1x128xf32>
    %33 = vector.broadcast %32 : vector<1x128xf32> to vector<128x128xf32>
    %34 = arith.addf %31, %33 : vector<128x128xf32>
    %35 = arith.negf %34 : vector<128x128xf32>
    %36 = math.exp %35 : vector<128x128xf32>
    %cst_26 = arith.constant 1.000000e+00 : f32
    %37 = vector.broadcast %cst_26 : f32 to vector<128x128xf32>
    %38 = arith.addf %37, %36 : vector<128x128xf32>
    %39 = arith.divf %37, %38 : vector<128x128xf32>
    %c0_27 = arith.constant 0 : index
    %c0_28 = arith.constant 0 : index
    %40 = vector.load %arg8[%c0_27, %c0_28] : memref<128x128xf32, #tpu.memory_space<vmem>>, vector<128x128xf32>
    tpu.vector_store %arg8[%c0_27, %c0_28], %39 {strides = array<i32>} : memref<128x128xf32, #tpu.memory_space<vmem>>, vector<128x128xf32>,
    return
  }
  func.func @transform_0(%arg0: i32) -> (i32, i32) {
    %c0_i32 = arith.constant 0 : i32
    %c0_i32_0 = arith.constant 0 : i32
    return %arg0, %c0_i32 : i32, i32
  }
  func.func @transform_1(%arg0: i32) -> (i32, i32) {
    %c0_i32 = arith.constant 0 : i32
    %c0_i32_0 = arith.constant 0 : i32
    %c0_i32_1 = arith.constant 0 : i32
    return %c0_i32, %c0_i32_0 : i32, i32
  }
  func.func @transform_2(%arg0: i32) -> (i32, i32) {
    %c0_i32 = arith.constant 0 : i32
    %c0_i32_0 = arith.constant 0 : i32
    %c0_i32_1 = arith.constant 0 : i32
    return %c0_i32, %c0_i32_0 : i32, i32
  }
  func.func @transform_3(%arg0: i32) -> (i32, i32, i32) {
    %c0_i32 = arith.constant 0 : i32
    %c0_i32_0 = arith.constant 0 : i32
    %c0_i32_1 = arith.constant 0 : i32
    %c0_i32_2 = arith.constant 0 : i32
    return %c0_i32, %c0_i32_0, %c0_i32_1 : i32, i32, i32
  }
  func.func @transform_4(%arg0: i32) -> (i32, i32, i32) {
    %c0_i32 = arith.constant 0 : i32
    %c0_i32_0 = arith.constant 0 : i32
    %c0_i32_1 = arith.constant 0 : i32
    %c0_i32_2 = arith.constant 0 : i32
    return %c0_i32, %c0_i32_0, %c0_i32_1 : i32, i32, i32
  }
  func.func @transform_5(%arg0: i32) -> (i32, i32) {
    %c0_i32 = arith.constant 0 : i32
    %c0_i32_0 = arith.constant 0 : i32
    %c0_i32_1 = arith.constant 0 : i32
    return %c0_i32, %c0_i32_0 : i32, i32
  }
  func.func @transform_6(%arg0: i32) -> (i32, i32) {
    %c0_i32 = arith.constant 0 : i32
    %c0_i32_0 = arith.constant 0 : i32
    %c0_i32_1 = arith.constant 0 : i32
    return %c0_i32, %c0_i32_0 : i32, i32
  }
  func.func @transform_7(%arg0: i32) -> (i32, i32) {
    %c0_i32 = arith.constant 0 : i32
    %c0_i32_0 = arith.constant 0 : i32
    return %arg0, %c0_i32 : i32, i32
  }
}

module attributes {stable_mosaic.version = 11 : i64} {
  func.func @_mlp_bc_kernel(%arg0: i32, %arg1: memref<128x24xf32, #tpu.memory_space<vmem>>, %arg2: memref<24x128xbf16, #tpu.memory_space<vmem>>, %arg3: memref<1x128xf32, #tpu.memory_space<vmem>>, %arg4: memref<2x128x128xbf16, #tpu.memory_space<vmem>>, %arg5: memref<2x1x128xf32, #tpu.memory_space<vmem>>, %arg6: memref<128x128xbf16, #tpu.memory_space<vmem>>, %arg7: memref<1x128xf32, #tpu.memory_space<vmem>>, %arg8: memref<128x128xf32, #tpu.memory_space<vmem>>) attributes {dimension_semantics = [#tpu.dimension_semantics<parallel>], iteration_bounds = array<i64: 2>, scalar_prefetch = 0 : i64, scratch_operands = 0 : i64, tpu.core_type = #tpu.core_type<tc>, window_params = [{transform_indices = @transform_0, window_bounds = array<i64: 128, 24>}, {pipeline_mode = #tpu.pipeline_mode<synchronous>, transform_indices = @transform_1, window_bounds = array<i64: 24, 128>}, {pipeline_mode = #tpu.pipeline_mode<synchronous>, transform_indices = @transform_2, window_bounds = array<i64: 1, 128>}, {pipeline_mode = #tpu.pipeline_mode<synchronous>, transform_indices = @transform_3, window_bounds = array<i64: 2, 128, 128>}, {pipeline_mode = #tpu.pipeline_mode<synchronous>, transform_indices = @transform_4, window_bounds = array<i64: 2, 1, 128>}, {pipeline_mode = #tpu.pipeline_mode<synchronous>, transform_indices = @transform_5, window_bounds = array<i64: 128, 128>}, {pipeline_mode = #tpu.pipeline_mode<synchronous>, transform_indices = @transform_6, window_bounds = array<i64: 1, 128>}, {transform_indices = @transform_7, window_bounds = array<i64: 128, 128>}]} {
    %c0 = arith.constant 0 : index
    %c0_0 = arith.constant 0 : index
    %0 = vector.load %arg1[%c0, %c0_0] : memref<128x24xf32, #tpu.memory_space<vmem>>, vector<128x24xf32>
    %1 = arith.truncf %0 : vector<128x24xf32> to vector<128x24xbf16>
    %c0_1 = arith.constant 0 : index
    %c0_2 = arith.constant 0 : index
    %2 = vector.load %arg2[%c0_1, %c0_2] : memref<24x128xbf16, #tpu.memory_space<vmem>>, vector<24x128xbf16>
    %cst = arith.constant dense<0.000000e+00> : vector<128x128xf32>
    %3 = tpu.matmul %1, %2, %cst {dimension_numbers = #tpu.dot_dimension_numbers<[1], [0], [0], [1], [0, 0, 1, 1], [], []>} : vector<128x24xbf16>, vector<24x128xbf16>, vector<128x128xf32> -> vector<128x128xf32>
    %c0_3 = arith.constant 0 : index
    %c0_4 = arith.constant 0 : index
    %4 = vector.load %arg3[%c0_3, %c0_4] : memref<1x128xf32, #tpu.memory_space<vmem>>, vector<1x128xf32>
    %5 = vector.broadcast %4 : vector<1x128xf32> to vector<128x128xf32>
    %6 = arith.addf %3, %5 : vector<128x128xf32>
    %cst_5 = arith.constant 0.000000e+00 : f32
    %7 = vector.broadcast %cst_5 : f32 to vector<128x128xf32>
    %8 = arith.maximumf %6, %7 : vector<128x128xf32>
    %9 = arith.truncf %8 : vector<128x128xf32> to vector<128x128xbf16>
    %c0_6 = arith.constant 0 : index
    %c0_7 = arith.constant 0 : index
    %c0_8 = arith.constant 0 : index
    %10 = vector.load %arg4[%c0_6, %c0_7, %c0_8] : memref<2x128x128xbf16, #tpu.memory_space<vmem>>, vector<1x128x128xbf16>
    %11 = vector.shape_cast %10 : vector<1x128x128xbf16> to vector<128x128xbf16>
    %cst_9 = arith.constant dense<0.000000e+00> : vector<128x128xf32>
    %12 = tpu.matmul %9, %11, %cst_9 {dimension_numbers = #tpu.dot_dimension_numbers<[1], [0], [0], [1], [0, 0, 1, 1], [], []>} : vector<128x128xbf16>, vector<128x128xbf16>, vector<128x128xf32> -> vector<128x128xf32>
    %c0_10 = arith.constant 0 : index
    %c0_11 = arith.constant 0 : index
    %c0_12 = arith.constant 0 : index
    %13 = vector.load %arg5[%c0_10, %c0_11, %c0_12] : memref<2x1x128xf32, #tpu.memory_space<vmem>>, vector<1x1x128xf32>
    %14 = vector.shape_cast %13 : vector<1x1x128xf32> to vector<1x128xf32>
    %15 = vector.broadcast %14 : vector<1x128xf32> to vector<128x128xf32>
    %16 = arith.addf %12, %15 : vector<128x128xf32>
    %cst_13 = arith.constant 0.000000e+00 : f32
    %17 = vector.broadcast %cst_13 : f32 to vector<128x128xf32>
    %18 = arith.maximumf %16, %17 : vector<128x128xf32>
    %19 = arith.truncf %18 : vector<128x128xf32> to vector<128x128xbf16>
    %c1 = arith.constant 1 : index
    %c0_14 = arith.constant 0 : index
    %c0_15 = arith.constant 0 : index
    %20 = vector.load %arg4[%c1, %c0_14, %c0_15] : memref<2x128x128xbf16, #tpu.memory_space<vmem>>, vector<1x128x128xbf16>
    %21 = vector.shape_cast %20 : vector<1x128x128xbf16> to vector<128x128xbf16>
    %cst_16 = arith.constant dense<0.000000e+00> : vector<128x128xf32>
    %22 = tpu.matmul %19, %21, %cst_16 {dimension_numbers = #tpu.dot_dimension_numbers<[1], [0], [0], [1], [0, 0, 1, 1], [], []>} : vector<128x128xbf16>, vector<128x128xbf16>, vector<128x128xf32> -> vector<128x128xf32>
    %c1_17 = arith.constant 1 : index
    %c0_18 = arith.constant 0 : index
    %c0_19 = arith.constant 0 : index
    %23 = vector.load %arg5[%c1_17, %c0_18, %c0_19] : memref<2x1x128xf32, #tpu.memory_space<vmem>>, vector<1x1x128xf32>
    %24 = vector.shape_cast %23 : vector<1x1x128xf32> to vector<1x128xf32>
    %25 = vector.broadcast %24 : vector<1x128xf32> to vector<128x128xf32>
    %26 = arith.addf %22, %25 : vector<128x128xf32>
    %cst_20 = arith.constant 0.000000e+00 : f32
    %27 = vector.broadcast %cst_20 : f32 to vector<128x128xf32>
    %28 = arith.maximumf %26, %27 : vector<128x128xf32>
    %29 = arith.truncf %28 : vector<128x128xf32> to vector<128x128xbf16>
    %c0_21 = arith.constant 0 : index
    %c0_22 = arith.constant 0 : index
    %30 = vector.load %arg6[%c0_21, %c0_22] : memref<128x128xbf16, #tpu.memory_space<vmem>>, vector<128x128xbf16>
    %cst_23 = arith.constant dense<0.000000e+00> : vector<128x128xf32>
    %31 = tpu.matmul %29, %30, %cst_23 {dimension_numbers = #tpu.dot_dimension_numbers<[1], [0], [0], [1], [0, 0, 1, 1], [], []>} : vector<128x128xbf16>, vector<128x128xbf16>, vector<128x128xf32> -> vector<128x128xf32>
    %c0_24 = arith.constant 0 : index
    %c0_25 = arith.constant 0 : index
    %32 = vector.load %arg7[%c0_24, %c0_25] : memref<1x128xf32, #tpu.memory_space<vmem>>, vector<1x128xf32>
    %33 = vector.broadcast %32 : vector<1x128xf32> to vector<128x128xf32>
    %34 = arith.addf %31, %33 : vector<128x128xf32>
    %35 = arith.negf %34 : vector<128x128xf32>
    %36 = math.exp %35 : vector<128x128xf32>
    %cst_26 = arith.constant 1.000000e+00 : f32
    %37 = vector.broadcast %cst_26 : f32 to vector<128x128xf32>
    %38 = arith.addf %37, %36 : vector<128x128xf32>
    %39 = arith.divf %37, %38 : vector<128x128xf32>
    %c0_27 = arith.constant 0 : index
    %c0_28 = arith.constant 0 : index
    %40 = vector.load %arg8[%c0_27, %c0_28] : memref<128x128xf32, #tpu.memory_space<vmem>>, vector<128x128xf32>
    tpu.vector_store %arg8[%c0_27, %c0_28], %39 {strides = array<i32>} : memref<128x128xf32, #tpu.memory_space<vmem>>, vector<128x128xf32>,
    return
  }
  func.func @transform_0(%arg0: i32) -> (i32, i32) {
    %c0_i32 = arith.constant 0 : i32
    %c0_i32_0 = arith.constant 0 : i32
    return %arg0, %c0_i32 : i32, i32
  }
  func.func @transform_1(%arg0: i32) -> (i32, i32) {
    %c0_i32 = arith.constant 0 : i32
    %c0_i32_0 = arith.constant 0 : i32
    %c0_i32_1 = arith.constant 0 : i32
    return %c0_i32, %c0_i32_0 : i32, i32
  }
  func.func @transform_2(%arg0: i32) -> (i32, i32) {
    %c0_i32 = arith.constant 0 : i32
    %c0_i32_0 = arith.constant 0 : i32
    %c0_i32_1 = arith.constant 0 : i32
    return %c0_i32, %c0_i32_0 : i32, i32
  }
  func.func @transform_3(%arg0: i32) -> (i32, i32, i32) {
    %c0_i32 = arith.constant 0 : i32
    %c0_i32_0 = arith.constant 0 : i32
    %c0_i32_1 = arith.constant 0 : i32
    %c0_i32_2 = arith.constant 0 : i32
    return %c0_i32, %c0_i32_0, %c0_i32_1 : i32, i32, i32
  }
  func.func @transform_4(%arg0: i32) -> (i32, i32, i32) {
    %c0_i32 = arith.constant 0 : i32
    %c0_i32_0 = arith.constant 0 : i32
    %c0_i32_1 = arith.constant 0 : i32
    %c0_i32_2 = arith.constant 0 : i32
    return %c0_i32, %c0_i32_0, %c0_i32_1 : i32, i32, i32
  }
  func.func @transform_5(%arg0: i32) -> (i32, i32) {
    %c0_i32 = arith.constant 0 : i32
    %c0_i32_0 = arith.constant 0 : i32
    %c0_i32_1 = arith.constant 0 : i32
    return %c0_i32, %c0_i32_0 : i32, i32
  }
  func.func @transform_6(%arg0: i32) -> (i32, i32) {
    %c0_i32 = arith.constant 0 : i32
    %c0_i32_0 = arith.constant 0 : i32
    %c0_i32_1 = arith.constant 0 : i32
    return %c0_i32, %c0_i32_0 : i32, i32
  }
  func.func @transform_7(%arg0: i32) -> (i32, i32) {
    %c0_i32 = arith.constant 0 : i32
    %c0_i32_0 = arith.constant 0 : i32
    return %arg0, %c0_i32 : i32, i32
  }
}

</mosaic_0001>

<bundles_post_ra>
// kernel: tpu_custom_call.1
= control target key start
LH: loop header
LB: loop body
LE: loop exit
PB: predicated region body
PF: predicated region fallthrough
CT: control target
= control target key end

     0   :  { %12 = vsyncpa [#allocation3], 0  ;;  %s1893_s0 = inlined_call_operand.vmem [shape: f32[256,24], index: 0, kind: input, shape index: {}]   ;;  %s1894_s1 = inlined_call_operand.vmem [shape: bf16[24,128], index: 1, kind: input, shape index: {}]   ;;  %s1895_s2 = inlined_call_operand.vmem [shape: f32[1,128], index: 2, kind: input, shape index: {}]   ;;  %s1896_s3 = inlined_call_operand.vmem [shape: bf16[2,128,128], index: 3, kind: input, shape index: {}]   ;;  %s1897_s4 = inlined_call_operand.vmem [shape: f32[2,1,128], index: 4, kind: input, shape index: {}]   ;;  %s1898_s5 = inlined_call_operand.vmem [shape: bf16[128,128], index: 5, kind: input, shape index: {}]   ;;  %s1899_s6 = inlined_call_operand.vmem [shape: f32[1,128], index: 6, kind: input, shape index: {}]   ;;  %s1900_s7 = inlined_call_operand.hbm [shape: f32[256,128], index: 7, kind: output, shape index: {}]  }
   0x1   :  { %14 = vsyncpa [#allocation3 + $0x1], 0  ;;  %s1616_s24 = smov 0   ;;  %s1618_s25 = smov 0  }
   0x2   :  { %s1620_s26 = smov 0   ;;  %s1622_s27 = smov 0  }
   0x3 LB: > { %s1637_s28 = sadd.s32 4294967295, %s1572_s27   ;;  %s1222_s29 = sadd.s32 4294967294, %s1572_s27   ;;  %s1572_s27 = sphi %s1622_s27, %s1906_s27   ;;  %s1568_s26 = sphi %s1620_s26, %s1905_s26   ;;  %s1564_s25 = sphi %s1618_s25, %s1904_s25   ;;  %s1560_s24 = sphi %s1616_s24, %s1903_s24  }
   0x4   : > { %s1641_s30 = sadd.s32 1, %s1572_s27   ;;  %s179_s8 = sadd.s32 1, %s1568_s26 }
   0x5   : > { %s176_s9 = ssub.s32 %s1572_s27, %s1641_s30  ;;  %p189_p0 = scmp.ne.s32.totalorder %s1568_s26, %s1564_s25 }
   0x6   : > { %p177_p1 = scmp.eq.s32.totalorder %s176_s9, 0  ;;  %p190_p2 = scmp.eq.s32.totalorder %s1637_s28, 1 }
   0x7   : > { %p195_p3 = scmp.ne.s32.totalorder %s1564_s25, %s1560_s24  ;;  %p196_p4 = scmp.eq.s32.totalorder %s1222_s29, 1 }
   0x8   : > { %s1652_s10 = scalar_select %p177_p1, %s1568_s26, %s179_s8  }
   0x9   : > { %p1654_p5 = por %p190_p2, %p189_p0  ;;  %p1658_p6 = por %p196_p4, %p195_p3 }
   0xa   : > { %p1225_p7 = scmp.ge.s32.totalorder %s1572_s27, 1  ;;  %p241_p8 = scmp.lt.s32.totalorder %s1572_s27, 3 }
   0xc   : > { %p242_p9 = pnand %p1225_p7, %p241_p8 }
   0xd   : > { %s1227_s15 = sshll.u32 (!%p242_p9), %s1637_s28, 4  ;;  %s270_s23 = sand.u32 (!%p242_p9), 1, %s1564_s25  }
   0xe   : > { %245 = sbr.rel (%p242_p9) target bundleno = 744 (0x2e8), region = 48  ;;  %p274_p10 = scmp.lt.s32.totalorder (!%p242_p9), %s1227_s15, 31 }
   0xf   : > { %s1226_s29 = sshll.u32 (!%p242_p9), %s270_s23, 7  ;;  %s1400_s9 = sshll.u32 (!%p242_p9), %s1637_s28, 7 }
  0x10   : > { %s1829_s8 = scalar_lea.vmem (!%p242_p9), [#allocation2], %s1226_s29  ;;  %s1156_s14 = scalar_lea.hbm (!%p242_p9), %s1900_s7, %s1400_s9 }
  0x11   : > { %s1157_s28 = sshll.u32 (!%p242_p9), %s1829_s8, 4  ;;  %s1530_s22 = scalar_lea.hbm (!%p242_p9), %s1900_s7, 256  ;;  %s1158_s28 = int_to_ptr.vmem [resolvable:$true] %s1157_s28 }
  0x13   : > { %v307_v0 = vld [vmem:[%s1894_s1 + $0x8] sm:$0xf]  ;;  %vm346_vm0 = vcmask 1043456   ;;  %s1908_s15 = smov (!%p274_p10, %s1227_s15), 31  ;;  %v1375_v4 = vld [vmem:[%s1894_s1] sm:$0xff]  ;;  %vm321_vm1 = vcmask 195584  }
  0x14   : > { %v317_v1 = vunpack.c.l.b16 %v307_v0  ;;  %s1228_s16 = sshll.u32 %s1908_s15, 3  ;;  %v1383_v20 = vld [vmem:[%s1896_s3 + $0x38] sm:$0xff]  ;;  %v1382_v24 = vld [vmem:[%s1896_s3 + $0x30] sm:$0xff]  ;;  %v1381_v25 = vld [vmem:[%s1896_s3 + $0x28] sm:$0xff]  ;;  %s1159_s15 = sshll.u32 %s1156_s14, 4  ;;  %s1160_s15 = int_to_ptr.hbm [resolvable:$true] %s1159_s15 }
  0x15   : > { %s1674_s21 = scalar_lea.vmem %s1893_s0, %s1228_s16  ;;  %491 = vmatpush.bf16.msra.mxu1 %v1383_v20  ;;  %v1380_v26 = vld [vmem:[%s1896_s3 + $0x20] sm:$0xff]  ;;  %v1379_v29 = vld [vmem:[%s1896_s3 + $0x18] sm:$0xff]  ;;  %v1378_v31 = vld [vmem:[%s1896_s3 + $0x10] sm:$0xff]  ;;  %s1145_s16 = scalar_lea.sflag [#allocation3], %s270_s23 }
  0x16   : > { %v319_v2 = vpack.c.b16 %v317_v1, %v317_v1  ;;  %v281_v5 = vld [vmem:[%s1674_s21] sm:$0xff]  ;;  %v282_v6 = vld [vmem:[%s1674_s21 + $0x8] sm:$0xff]  ;;  %v283_v8 = vld [vmem:[%s1674_s21 + $0x10] sm:$0xff]  ;;  %s1524_s17 = sshra.s32 %s1160_s15, 4  ;;  %s1525_s17 = int_to_ptr.hbm [resolvable:$true] %s1524_s17 }
  0x17   : > { %v297_v7 = vpack.c.bf16 %v282_v6, %v281_v5  ;;  %v284_v9 = vld [vmem:[%s1674_s21 + $0x18] sm:$0xff]  ;;  %v285_v11 = vld [vmem:[%s1674_s21 + $0x20] sm:$0xff]  ;;  %v286_v12 = vld [vmem:[%s1674_s21 + $0x28] sm:$0xff]  ;;  %s1526_s18 = scalar_lea.hbm %s1525_s17, 128  ;;  %p1531_p0 = scmp.lt.s32.totalorder %s1525_s17, %s1900_s7 }
  0x18   : > { %v348_v3 = vsel %vm346_vm0, %v319_v2, 0  ;;  %v298_v10 = vpack.c.bf16 %v284_v9, %v283_v8  ;;  %v299_v13 = vpack.c.bf16 %v286_v12, %v285_v11  ;;  %v287_v14 = vld [vmem:[%s1674_s21 + $0x30] sm:$0xff]  ;;  %v288_v15 = vld [vmem:[%s1674_s21 + $0x38] sm:$0xff]  ;;  %v289_v17 = vld [vmem:[%s1674_s21 + $0x40] sm:$0xff]  ;;  %p1527_p11 = scmp.ne.s32.totalorder %s1525_s17, %s1526_s18  ;;  %p1532_p1 = scmp.lt.s32.totalorder %s1530_s22, %s1526_s18 }
  0x19   : > { %356 = vmatpush.bf16.msra.mxu0 %v348_v3  ;;  %v300_v16 = vpack.c.bf16 %v288_v15, %v287_v14  ;;  %v290_v18 = vld [vmem:[%s1674_s21 + $0x48] sm:$0xff]  ;;  %v291_v21 = vld [vmem:[%s1674_s21 + $0x50] sm:$0xff]  ;;  %v292_v22 = vld [vmem:[%s1674_s21 + $0x58] sm:$0xff]  ;;  %492 = vmatpush.bf16.msra.mxu1 %v1382_v24 }
  0x1a   : > { %v301_v19 = vpack.c.bf16 %v290_v18, %v289_v17  ;;  %v302_v23 = vpack.c.bf16 %v292_v22, %v291_v21  ;;  %v293_v27 = vld [vmem:[%s1674_s21 + $0x60] sm:$0xff]  ;;  %v294_v28 = vld [vmem:[%s1674_s21 + $0x68] sm:$0xff]  ;;  %v295_v34 = vld [vmem:[%s1674_s21 + $0x70] sm:$0xff]  ;;  %p1528_p12 = pnand %p1527_p11, %p1654_p5  ;;  %p1533_p2 = por %p1532_p1, %p1531_p0 }
  0x1b   : > { %v303_v30 = vpack.c.bf16 %v294_v28, %v293_v27  ;;  %v1377_v32 = vld [vmem:[%s1896_s3 + $0x8] sm:$0xff]  ;;  %v1376_v33 = vld [vmem:[%s1896_s3] sm:$0xff]  ;;  %v296_v35 = vld [vmem:[%s1674_s21 + $0x78] sm:$0xff] }
  0x1c   : > { %v304_v36 = vpack.c.bf16 %v296_v35, %v295_v34  ;;  %v1727_v38 = vld [vmem:[%s1895_s2] ss:$0 sm:$0xff]  ;;  %v1390_v17 = vld [vmem:[%s1896_s3 + $0x70] sm:$0xff]  ;;  %v1387_v24 = vld [vmem:[%s1896_s3 + $0x58] sm:$0xff]  ;;  %p1529_p13 = pneg %p1528_p12 }
  0x1d   : > { %357 = vmatpush.bf16.msra.mxu0 %v1375_v4  ;;  %493 = vmatpush.bf16.msra.mxu1 %v1381_v25  ;;  %v1388_v20 = vld [vmem:[%s1896_s3 + $0x60] sm:$0xff]  ;;  %v1386_v28 = vld [vmem:[%s1896_s3 + $0x50] sm:$0xff] }
  0x1e   : > { %p1534_p3 = pnand %p1533_p2, %p1529_p13 }
  0x20   : > { %1233 = vmatmul.msk.bf16.vlgmr.msra.gmra.mxu0 %vm321_vm1, %v297_v7 }
  0x21   : > { %494 = vmatpush.bf16.msra.mxu1 %v1380_v26 }
  0x25   : > { %495 = vmatpush.bf16.msra.mxu1 %v1379_v29 }
  0x29   : > { %496 = vmatpush.bf16.msra.mxu1 %v1378_v31  ;;  %v1384_v31 = vld [vmem:[%s1896_s3 + $0x40] sm:$0xff] }
  0x2d   : > { %497 = vmatpush.bf16.msra.mxu1 %v1377_v32 }
  0x30   : > { %1234 = vmatmul.msk.bf16.gmra.mxu0 %vm321_vm1, %v298_v10 }
  0x31   : > { %498 = vmatpush.bf16.msra.mxu1 %v1376_v33 }
  0x40   : > { %1235 = vmatmul.msk.bf16.gmra.mxu0 %vm321_vm1, %v299_v13  ;;  %v1391_v13 = vld [vmem:[%s1896_s3 + $0x78] sm:$0xff] }
  0x41   : > { %634 = vmatpush.bf16.msra.mxu2 %v1391_v13 }
  0x45   : > { %635 = vmatpush.bf16.msra.mxu2 %v1390_v17  ;;  %v1399_v17 = vld [vmem:[%s1898_s5 + $0x38] sm:$0xff] }
  0x46   : > { %775 = vmatpush.bf16.msra.mxu3 %v1399_v17 }
  0x50   : > { %1236 = vmatmul.msk.bf16.gmra.mxu0 %vm321_vm1, %v300_v16 }
  0x60   : > { %1237 = vmatmul.msk.bf16.gmra.mxu0 %vm321_vm1, %v301_v19  ;;  %v1389_v19 = vld [vmem:[%s1896_s3 + $0x68] sm:$0xff] }
  0x61   : > { %636 = vmatpush.bf16.msra.mxu2 %v1389_v19  ;;  %v1398_v19 = vld [vmem:[%s1898_s5 + $0x30] sm:$0xff] }
  0x62   : > { %776 = vmatpush.bf16.msra.mxu3 %v1398_v19 }
  0x65   : > { %637 = vmatpush.bf16.msra.mxu2 %v1388_v20  ;;  %v1397_v20 = vld [vmem:[%s1898_s5 + $0x28] sm:$0xff] }
  0x66   : > { %777 = vmatpush.bf16.msra.mxu3 %v1397_v20 }
  0x69   : > { %638 = vmatpush.bf16.msra.mxu2 %v1387_v24  ;;  %v1396_v24 = vld [vmem:[%s1898_s5 + $0x20] sm:$0xff] }
  0x6a   : > { %778 = vmatpush.bf16.msra.mxu3 %v1396_v24 }
  0x6d   : > { %639 = vmatpush.bf16.msra.mxu2 %v1386_v28 }
  0x70   : > { %1238 = vmatmul.msk.bf16.gmra.mxu0 %vm321_vm1, %v302_v23 }
  0x80   : > { %1239 = vmatmul.msk.bf16.gmra.mxu0 %vm321_vm1, %v303_v30  ;;  %v1385_v30 = vld [vmem:[%s1896_s3 + $0x48] sm:$0xff] }
  0x81   : > { %640 = vmatpush.bf16.msra.mxu2 %v1385_v30  ;;  %v1394_v30 = vld [vmem:[%s1898_s5 + $0x10] sm:$0xff] }
  0x85   : > { %641 = vmatpush.bf16.msra.mxu2 %v1384_v31 }
  0x90   : > { %1240 = vmatmul.msk.bf16.gmra.mxu0 %vm321_vm1, %v304_v36 }
  0x9d   : > { %v359_v37 = vpop.f32.mrf.mxu0 }
  0x9e   : > { %v360_v39 = vadd.f32 %v1727_v38, %v359_v37 }
  0xa0   : > { %v399_v42 = vmax.f32 %v360_v39, 0.0 }
  0xa5   : > { %v361_v40 = vpop.f32.mrf.mxu0 }
  0xa6   : > { %v362_v41 = vadd.f32 %v1727_v38, %v361_v40  ;;  %v1772_v40 = vld [vmem:[%s1897_s4] ss:$0 sm:$0xff] }
  0xa8   : > { %v400_v43 = vmax.f32 %v362_v41, 0.0 }
  0xaa   : > { %v415_v44 = vpack.c.bf16 %v400_v43, %v399_v42 }
  0xac   : > { %499 = vmatmul.bf16.vlgmr.msra.gmra.mxu1 %v415_v44 }
  0xad   : > { %v364_v45 = vpop.f32.mrf.mxu0 }
  0xae   : > { %v365_v46 = vadd.f32 %v1727_v38, %v364_v45 }
  0xb0   : > { %v401_v49 = vmax.f32 %v365_v46, 0.0 }
  0xb5   : > { %v366_v47 = vpop.f32.mrf.mxu0 }
  0xb6   : > { %v367_v48 = vadd.f32 %v1727_v38, %v366_v47 }
  0xb8   : > { %v402_v50 = vmax.f32 %v367_v48, 0.0 }
  0xba   : > { %v416_v51 = vpack.c.bf16 %v402_v50, %v401_v49 }
  0xbc   : > { %504 = vmatmul.bf16.gmra.mxu1 %v416_v51 }
  0xbd   : > { %v369_v52 = vpop.f32.mrf.mxu0 }
  0xbe   : > { %v370_v53 = vadd.f32 %v1727_v38, %v369_v52 }
  0xc0   : > { %v403_v56 = vmax.f32 %v370_v53, 0.0 }
  0xc5   : > { %v371_v54 = vpop.f32.mrf.mxu0 }
  0xc6   : > { %v372_v55 = vadd.f32 %v1727_v38, %v371_v54 }
  0xc8   : > { %v404_v57 = vmax.f32 %v372_v55, 0.0 }
  0xca   : > { %v417_v58 = vpack.c.bf16 %v404_v57, %v403_v56 }
  0xcc   : > { %509 = vmatmul.bf16.gmra.mxu1 %v417_v58 }
  0xcd   : > { %v374_v59 = vpop.f32.mrf.mxu0 }
  0xce   : > { %v375_v60 = vadd.f32 %v1727_v38, %v374_v59 }
  0xd0   : > { %v405_v63 = vmax.f32 %v375_v60, 0.0 }
  0xd5   : > { %v376_v61 = vpop.f32.mrf.mxu0 }
  0xd6   : > { %v377_v62 = vadd.f32 %v1727_v38, %v376_v61 }
  0xd8   : > { %v406_v0 = vmax.f32 %v377_v62, 0.0 }
  0xda   : > { %v418_v1 = vpack.c.bf16 %v406_v0, %v405_v63 }
  0xdc   : > { %514 = vmatmul.bf16.gmra.mxu1 %v418_v1 }
  0xdd   : > { %v379_v2 = vpop.f32.mrf.mxu0 }
  0xde   : > { %v380_v3 = vadd.f32 %v1727_v38, %v379_v2 }
  0xe0   : > { %v407_v6 = vmax.f32 %v380_v3, 0.0 }
  0xe5   : > { %v381_v4 = vpop.f32.mrf.mxu0 }
  0xe6   : > { %v382_v5 = vadd.f32 %v1727_v38, %v381_v4 }
  0xe8   : > { %v408_v7 = vmax.f32 %v382_v5, 0.0 }
  0xea   : > { %v419_v8 = vpack.c.bf16 %v408_v7, %v407_v6 }
  0xec   : > { %519 = vmatmul.bf16.gmra.mxu1 %v419_v8 }
  0xed   : > { %v384_v9 = vpop.f32.mrf.mxu0 }
  0xee   : > { %v385_v10 = vadd.f32 %v1727_v38, %v384_v9 }
  0xf0   : > { %v409_v14 = vmax.f32 %v385_v10, 0.0 }
  0xf5   : > { %v386_v11 = vpop.f32.mrf.mxu0 }
  0xf6   : > { %v387_v12 = vadd.f32 %v1727_v38, %v386_v11 }
  0xf8   : > { %v410_v15 = vmax.f32 %v387_v12, 0.0 }
  0xfa   : > { %v420_v16 = vpack.c.bf16 %v410_v15, %v409_v14 }
  0xfc   : > { %524 = vmatmul.bf16.gmra.mxu1 %v420_v16 }
  0xfd   : > { %v389_v18 = vpop.f32.mrf.mxu0 }
  0xfe   : > { %v390_v21 = vadd.f32 %v1727_v38, %v389_v18 }
 0x100   : > { %v411_v25 = vmax.f32 %v390_v21, 0.0 }
 0x105   : > { %v391_v22 = vpop.f32.mrf.mxu0 }
 0x106   : > { %v392_v23 = vadd.f32 %v1727_v38, %v391_v22 }
 0x108   : > { %v412_v26 = vmax.f32 %v392_v23, 0.0 }
 0x10a   : > { %v421_v27 = vpack.c.bf16 %v412_v26, %v411_v25 }
 0x10c   : > { %529 = vmatmul.bf16.gmra.mxu1 %v421_v27 }
 0x10d   : > { %v394_v29 = vpop.f32.mrf.mxu0 }
 0x10e   : > { %v395_v32 = vadd.f32 %v1727_v38, %v394_v29  ;;  %v1395_v29 = vld [vmem:[%s1898_s5 + $0x18] sm:$0xff] }
 0x10f   : > { %779 = vmatpush.bf16.msra.mxu3 %v1395_v29 }
 0x110   : > { %v413_v35 = vmax.f32 %v395_v32, 0.0 }
 0x113   : > { %780 = vmatpush.bf16.msra.mxu3 %v1394_v30 }
 0x115   : > { %v396_v33 = vpop.f32.mrf.mxu0 }
 0x116   : > { %v397_v34 = vadd.f32 %v1727_v38, %v396_v33  ;;  %v1393_v33 = vld [vmem:[%s1898_s5 + $0x8] sm:$0xff] }
 0x117   : > { %781 = vmatpush.bf16.msra.mxu3 %v1393_v33 }
 0x118   : > { %v414_v36 = vmax.f32 %v397_v34, 0.0 }
 0x11a   : > { %v422_v37 = vpack.c.bf16 %v414_v36, %v413_v35 }
 0x11c   : > { %534 = vmatmul.bf16.gmra.mxu1 %v422_v37  ;;  %v1392_v37 = vld [vmem:[%s1898_s5] sm:$0xff] }
 0x11d   : > { %782 = vmatpush.bf16.msra.mxu3 %v1392_v37 }
 0x129   : > { %v500_v39 = vpop.f32.mrf.mxu1 }
 0x12a   : > { %v501_v41 = vadd.f32 %v1772_v40, %v500_v39 }
 0x12c   : > { %v540_v44 = vmax.f32 %v501_v41, 0.0 }
 0x131   : > { %v502_v42 = vpop.f32.mrf.mxu1 }
 0x132   : > { %v503_v43 = vadd.f32 %v1772_v40, %v502_v42  ;;  %v1444_v42 = vld [vmem:[%s1897_s4 + $0x1] ss:$0 sm:$0xff] }
 0x134   : > { %v541_v45 = vmax.f32 %v503_v43, 0.0 }
 0x136   : > { %v556_v46 = vpack.c.bf16 %v541_v45, %v540_v44 }
 0x138   : > { %642 = vmatmul.bf16.vlgmr.msra.gmra.mxu2 %v556_v46 }
 0x139   : > { %v505_v38 = vpop.f32.mrf.mxu1 }
 0x13a   : > { %v506_v47 = vadd.f32 %v1772_v40, %v505_v38 }
 0x13c   : > { %v542_v50 = vmax.f32 %v506_v47, 0.0 }
 0x141   : > { %v507_v48 = vpop.f32.mrf.mxu1 }
 0x142   : > { %v508_v49 = vadd.f32 %v1772_v40, %v507_v48 }
 0x144   : > { %v543_v51 = vmax.f32 %v508_v49, 0.0 }
 0x146   : > { %v557_v52 = vpack.c.bf16 %v543_v51, %v542_v50 }
 0x148   : > { %647 = vmatmul.bf16.gmra.mxu2 %v557_v52 }
 0x149   : > { %v510_v53 = vpop.f32.mrf.mxu1 }
 0x14a   : > { %v511_v54 = vadd.f32 %v1772_v40, %v510_v53 }
 0x14c   : > { %v544_v57 = vmax.f32 %v511_v54, 0.0 }
 0x151   : > { %v512_v55 = vpop.f32.mrf.mxu1 }
 0x152   : > { %v513_v56 = vadd.f32 %v1772_v40, %v512_v55 }
 0x154   : > { %v545_v58 = vmax.f32 %v513_v56, 0.0 }
 0x156   : > { %v558_v59 = vpack.c.bf16 %v545_v58, %v544_v57 }
 0x158   : > { %652 = vmatmul.bf16.gmra.mxu2 %v558_v59 }
 0x159   : > { %v515_v60 = vpop.f32.mrf.mxu1 }
 0x15a   : > { %v516_v61 = vadd.f32 %v1772_v40, %v515_v60 }
 0x15c   : > { %v546_v0 = vmax.f32 %v516_v61, 0.0 }
 0x161   : > { %v517_v62 = vpop.f32.mrf.mxu1 }
 0x162   : > { %v518_v63 = vadd.f32 %v1772_v40, %v517_v62 }
 0x164   : > { %v547_v1 = vmax.f32 %v518_v63, 0.0 }
 0x166   : > { %v559_v2 = vpack.c.bf16 %v547_v1, %v546_v0 }
 0x168   : > { %657 = vmatmul.bf16.gmra.mxu2 %v559_v2 }
 0x169   : > { %v520_v3 = vpop.f32.mrf.mxu1 }
 0x16a   : > { %v521_v4 = vadd.f32 %v1772_v40, %v520_v3 }
 0x16c   : > { %v548_v7 = vmax.f32 %v521_v4, 0.0 }
 0x171   : > { %v522_v5 = vpop.f32.mrf.mxu1 }
 0x172   : > { %v523_v6 = vadd.f32 %v1772_v40, %v522_v5 }
 0x174   : > { %v549_v8 = vmax.f32 %v523_v6, 0.0 }
 0x176   : > { %v560_v9 = vpack.c.bf16 %v549_v8, %v548_v7 }
 0x178   : > { %662 = vmatmul.bf16.gmra.mxu2 %v560_v9 }
 0x179   : > { %v525_v10 = vpop.f32.mrf.mxu1 }
 0x17a   : > { %v526_v11 = vadd.f32 %v1772_v40, %v525_v10 }
 0x17c   : > { %v550_v14 = vmax.f32 %v526_v11, 0.0 }
 0x181   : > { %v527_v12 = vpop.f32.mrf.mxu1 }
 0x182   : > { %v528_v13 = vadd.f32 %v1772_v40, %v527_v12 }
 0x184   : > { %v551_v15 = vmax.f32 %v528_v13, 0.0 }
 0x186   : > { %v561_v16 = vpack.c.bf16 %v551_v15, %v550_v14 }
 0x188   : > { %667 = vmatmul.bf16.gmra.mxu2 %v561_v16 }
 0x189   : > { %v530_v18 = vpop.f32.mrf.mxu1 }
 0x18a   : > { %v531_v21 = vadd.f32 %v1772_v40, %v530_v18 }
 0x18c   : > { %v552_v25 = vmax.f32 %v531_v21, 0.0 }
 0x191   : > { %v532_v22 = vpop.f32.mrf.mxu1 }
 0x192   : > { %v533_v23 = vadd.f32 %v1772_v40, %v532_v22 }
 0x194   : > { %v553_v26 = vmax.f32 %v533_v23, 0.0 }
 0x196   : > { %v562_v27 = vpack.c.bf16 %v553_v26, %v552_v25 }
 0x198   : > { %672 = vmatmul.bf16.gmra.mxu2 %v562_v27 }
 0x199   : > { %v535_v28 = vpop.f32.mrf.mxu1 }
 0x19a   : > { %v536_v31 = vadd.f32 %v1772_v40, %v535_v28 }
 0x19c   : > { %v554_v35 = vmax.f32 %v536_v31, 0.0 }
 0x1a1   : > { %v537_v32 = vpop.f32.mrf.mxu1 }
 0x1a2   : > { %v538_v34 = vadd.f32 %v1772_v40, %v537_v32  ;;  %v1820_v32 = vld [vmem:[%s1899_s6] ss:$0 sm:$0xff] }
 0x1a4   : > { %v555_v36 = vmax.f32 %v538_v34, 0.0 }
 0x1a6   : > { %v563_v39 = vpack.c.bf16 %v555_v36, %v554_v35 }
 0x1a8   : > { %677 = vmatmul.bf16.gmra.mxu2 %v563_v39 }
 0x1bb   : > { %v643_v41 = vpop.f32.mrf.mxu2 }
 0x1bc   : > { %v644_v43 = vadd.f32 %v1444_v42, %v643_v41 }
 0x1be   : > { %v683_v46 = vmax.f32 %v644_v43, 0.0 }
 0x1c3   : > { %v645_v44 = vpop.f32.mrf.mxu2 }
 0x1c4   : > { %v646_v45 = vadd.f32 %v1444_v42, %v645_v44 }
 0x1c6   : > { %v684_v40 = vmax.f32 %v646_v45, 0.0 }
 0x1c8   : > { %v699_v38 = vpack.c.bf16 %v684_v40, %v683_v46 }
 0x1ca   : > { %783 = vmatmul.bf16.vlgmr.msra.gmra.mxu3 %v699_v38 }
 0x1cb   : > { %v648_v47 = vpop.f32.mrf.mxu2 }
 0x1cc   : > { %v649_v48 = vadd.f32 %v1444_v42, %v648_v47 }
 0x1ce   : > { %v685_v51 = vmax.f32 %v649_v48, 0.0 }
 0x1d3   : > { %v650_v49 = vpop.f32.mrf.mxu2 }
 0x1d4   : > { %v651_v50 = vadd.f32 %v1444_v42, %v650_v49 }
 0x1d6   : > { %v686_v52 = vmax.f32 %v651_v50, 0.0 }
 0x1d8   : > { %v700_v53 = vpack.c.bf16 %v686_v52, %v685_v51 }
 0x1da   : > { %788 = vmatmul.bf16.gmra.mxu3 %v700_v53 }
 0x1db   : > { %v653_v54 = vpop.f32.mrf.mxu2 }
 0x1dc   : > { %v654_v55 = vadd.f32 %v1444_v42, %v653_v54 }
 0x1de   : > { %v687_v58 = vmax.f32 %v654_v55, 0.0 }
 0x1e3   : > { %v655_v56 = vpop.f32.mrf.mxu2 }
 0x1e4   : > { %v656_v57 = vadd.f32 %v1444_v42, %v655_v56 }
 0x1e6   : > { %v688_v59 = vmax.f32 %v656_v57, 0.0 }
 0x1e8   : > { %v701_v60 = vpack.c.bf16 %v688_v59, %v687_v58 }
 0x1ea   : > { %793 = vmatmul.bf16.gmra.mxu3 %v701_v60 }
 0x1eb   : > { %v658_v61 = vpop.f32.mrf.mxu2 }
 0x1ec   : > { %v659_v62 = vadd.f32 %v1444_v42, %v658_v61 }
 0x1ee   : > { %v689_v1 = vmax.f32 %v659_v62, 0.0 }
 0x1f3   : > { %v660_v63 = vpop.f32.mrf.mxu2 }
 0x1f4   : > { %v661_v0 = vadd.f32 %v1444_v42, %v660_v63 }
 0x1f6   : > { %v690_v2 = vmax.f32 %v661_v0, 0.0 }
 0x1f8   : > { %v702_v3 = vpack.c.bf16 %v690_v2, %v689_v1 }
 0x1fa   : > { %798 = vmatmul.bf16.gmra.mxu3 %v702_v3 }
 0x1fb   : > { %v663_v4 = vpop.f32.mrf.mxu2 }
 0x1fc   : > { %v664_v5 = vadd.f32 %v1444_v42, %v663_v4 }
 0x1fe   : > { %v691_v8 = vmax.f32 %v664_v5, 0.0 }
 0x203   : > { %v665_v6 = vpop.f32.mrf.mxu2 }
 0x204   : > { %v666_v7 = vadd.f32 %v1444_v42, %v665_v6 }
 0x206   : > { %v692_v9 = vmax.f32 %v666_v7, 0.0 }
 0x208   : > { %v703_v10 = vpack.c.bf16 %v692_v9, %v691_v8 }
 0x20a   : > { %803 = vmatmul.bf16.gmra.mxu3 %v703_v10 }
 0x20b   : > { %v668_v11 = vpop.f32.mrf.mxu2 }
 0x20c   : > { %v669_v12 = vadd.f32 %v1444_v42, %v668_v11 }
 0x20e   : > { %v693_v15 = vmax.f32 %v669_v12, 0.0 }
 0x213   : > { %v670_v13 = vpop.f32.mrf.mxu2 }
 0x214   : > { %v671_v14 = vadd.f32 %v1444_v42, %v670_v13 }
 0x216   : > { %v694_v16 = vmax.f32 %v671_v14, 0.0 }
 0x218   : > { %v704_v17 = vpack.c.bf16 %v694_v16, %v693_v15 }
 0x21a   : > { %808 = vmatmul.bf16.gmra.mxu3 %v704_v17 }
 0x21b   : > { %v673_v18 = vpop.f32.mrf.mxu2 }
 0x21c   : > { %v674_v19 = vadd.f32 %v1444_v42, %v673_v18 }
 0x21e   : > { %v695_v22 = vmax.f32 %v674_v19, 0.0 }
 0x223   : > { %v675_v20 = vpop.f32.mrf.mxu2 }
 0x224   : > { %v676_v21 = vadd.f32 %v1444_v42, %v675_v20 }
 0x226   : > { %v696_v23 = vmax.f32 %v676_v21, 0.0 }
 0x228   : > { %v705_v24 = vpack.c.bf16 %v696_v23, %v695_v22 }
 0x22a   : > { %813 = vmatmul.bf16.gmra.mxu3 %v705_v24 }
 0x22b   : > { %v678_v25 = vpop.f32.mrf.mxu2 }
 0x22c   : > { %v679_v26 = vadd.f32 %v1444_v42, %v678_v25 }
 0x22e   : > { %v697_v29 = vmax.f32 %v679_v26, 0.0 }
 0x233   : > { %v680_v27 = vpop.f32.mrf.mxu2 }
 0x234   : > { %v681_v28 = vadd.f32 %v1444_v42, %v680_v27 }
 0x236   : > { %v698_v30 = vmax.f32 %v681_v28, 0.0 }
 0x238   : > { %v706_v31 = vpack.c.bf16 %v698_v30, %v697_v29 }
 0x23a   : > { %818 = vmatmul.bf16.gmra.mxu3 %v706_v31 }
 0x24d   : > { %v784_v33 = vpop.f32.mrf.mxu3 }
 0x24e   : > { %v785_v34 = vadd.f32 %v1820_v32, %v784_v33 }
 0x250   : > { %v1354_v35 = vmul.f32 -1.442695, %v785_v34 }
 0x252   : > { %1446 = vpow2.f32 %v1354_v35 }
 0x255   : > { %v786_v36 = vpop.f32.mrf.mxu3 }
 0x256   : > { %v787_v37 = vadd.f32 %v1820_v32, %v786_v36 }
 0x258   : > { %v1447_v39 = vpop.eup %1446  ;;  %v1355_v41 = vmul.f32 -1.442695, %v787_v37 }
 0x259   : > { %v872_v42 = vadd.f32 1.0, %v1447_v39 }
 0x25a   : > { %1448 = vpow2.f32 %v1355_v41 }
 0x25b   : > { %1450 = vrcp.f32 %v872_v42  ;;  %v899_v49 = vand.u32 2147483648, %v872_v42  ;;  %v897_v52 = vand.u32 2147483647, %v872_v42  ;;  %vm893_vm3 = vweird.f32 %v872_v42 }
 0x25d   : > { %v789_v43 = vpop.f32.mrf.mxu3  ;;  %v900_v58 = vor.u32 1.1754944e-38, %v899_v49  ;;  %vm898_vm5 = vcmp.eq.f32.partialorder %v897_v52, 8.507059e+37 }
 0x25e   : > { %v790_v44 = vadd.f32 %v1820_v32, %v789_v43 }
 0x260   : > { %v1449_v45 = vpop.eup %1448  ;;  %v1356_v46 = vmul.f32 -1.442695, %v790_v44 }
 0x261   : > { %v1451_v40 = vpop.eup %1450  ;;  %v873_v38 = vadd.f32 1.0, %v1449_v45 }
 0x262   : > { %v889_v47 = vmul.f32 %v1451_v40, %v872_v42  ;;  %1452 = vpow2.f32 %v1356_v46  ;;  %vm894_vm2 = vweird.f32 %v1451_v40 }
 0x263   : > { %1454 = vrcp.f32 %v873_v38  ;;  %vm895_vm4 = vmor %vm893_vm3, %vm894_vm2  ;;  %v914_v0 = vand.u32 2147483648, %v873_v38  ;;  %v912_v3 = vand.u32 2147483647, %v873_v38  ;;  %vm908_vm7 = vweird.f32 %v873_v38 }
 0x264   : > { %v890_v48 = vsub.f32 1.0, %v889_v47 }
 0x265   : > { %v791_v50 = vpop.f32.mrf.mxu3  ;;  %v915_v9 = vor.u32 1.1754944e-38, %v914_v0  ;;  %vm913_vm9 = vcmp.eq.f32.partialorder %v912_v3, 8.507059e+37 }
 0x266   : > { %v891_v51 = vmul.f32 %v1451_v40, %v890_v48  ;;  %v792_v53 = vadd.f32 %v1820_v32, %v791_v50 }
 0x268   : > { %v1453_v54 = vpop.eup %1452  ;;  %v892_v55 = vadd.f32 %v1451_v40, %v891_v51  ;;  %v1357_v56 = vmul.f32 -1.442695, %v792_v53 }
 0x269   : > { %v1455_v57 = vpop.eup %1454  ;;  %v874_v59 = vadd.f32 1.0, %v1453_v54 }
 0x26a   : > { %v896_v60 = vsel %vm895_vm4, %v1451_v40, %v892_v55  ;;  %v904_v61 = vmul.f32 %v1455_v57, %v873_v38  ;;  %1456 = vpow2.f32 %v1357_v56  ;;  %vm909_vm6 = vweird.f32 %v1455_v57 }
 0x26b   : > { %v901_v62 = vsel %vm898_vm5, %v900_v58, %v896_v60  ;;  %1458 = vrcp.f32 %v874_v59  ;;  %vm910_vm8 = vmor %vm908_vm7, %vm909_vm6  ;;  %v929_v15 = vand.u32 2147483648, %v874_v59  ;;  %v927_v18 = vand.u32 2147483647, %v874_v59 }
 0x26c   : > { %1128 = vst [vmem:[%s1829_s8] sm:$0xff] %v901_v62  ;;  %v905_v63 = vsub.f32 1.0, %v904_v61  ;;  %vm923_vm11 = vweird.f32 %v874_v59 }
 0x26d   : > { %v794_v1 = vpop.f32.mrf.mxu3  ;;  %v930_v24 = vor.u32 1.1754944e-38, %v929_v15  ;;  %vm928_vm13 = vcmp.eq.f32.partialorder %v927_v18, 8.507059e+37 }
 0x26e   : > { %v906_v2 = vmul.f32 %v1455_v57, %v905_v63  ;;  %v795_v4 = vadd.f32 %v1820_v32, %v794_v1 }
 0x270   : > { %v1457_v5 = vpop.eup %1456  ;;  %v907_v6 = vadd.f32 %v1455_v57, %v906_v2  ;;  %v1358_v7 = vmul.f32 -1.442695, %v795_v4 }
 0x271   : > { %v1459_v8 = vpop.eup %1458  ;;  %v875_v10 = vadd.f32 1.0, %v1457_v5 }
 0x272   : > { %v911_v11 = vsel %vm910_vm8, %v1455_v57, %v907_v6  ;;  %v919_v12 = vmul.f32 %v1459_v8, %v874_v59  ;;  %1460 = vpow2.f32 %v1358_v7  ;;  %vm924_vm10 = vweird.f32 %v1459_v8 }
 0x273   : > { %v916_v13 = vsel %vm913_vm9, %v915_v9, %v911_v11  ;;  %1462 = vrcp.f32 %v875_v10  ;;  %vm925_vm12 = vmor %vm923_vm11, %vm924_vm10  ;;  %v944_v30 = vand.u32 2147483648, %v875_v10  ;;  %v942_v34 = vand.u32 2147483647, %v875_v10 }
 0x274   : > { %1129 = vst [vmem:[%s1829_s8 + $0x8] sm:$0xff] %v916_v13  ;;  %v920_v14 = vsub.f32 1.0, %v919_v12  ;;  %vm938_vm15 = vweird.f32 %v875_v10 }
 0x275   : > { %v796_v16 = vpop.f32.mrf.mxu3  ;;  %v945_v42 = vor.u32 1.1754944e-38, %v944_v30  ;;  %vm943_vm1 = vcmp.eq.f32.partialorder %v942_v34, 8.507059e+37 }
 0x276   : > { %v921_v17 = vmul.f32 %v1459_v8, %v920_v14  ;;  %v797_v19 = vadd.f32 %v1820_v32, %v796_v16 }
 0x278   : > { %v1461_v20 = vpop.eup %1460  ;;  %v922_v21 = vadd.f32 %v1459_v8, %v921_v17  ;;  %v1359_v22 = vmul.f32 -1.442695, %v797_v19 }
 0x279   : > { %v1463_v23 = vpop.eup %1462  ;;  %v876_v25 = vadd.f32 1.0, %v1461_v20 }
 0x27a   : > { %v926_v26 = vsel %vm925_vm12, %v1459_v8, %v922_v21  ;;  %v934_v27 = vmul.f32 %v1463_v23, %v875_v10  ;;  %1464 = vpow2.f32 %v1359_v22  ;;  %vm939_vm14 = vweird.f32 %v1463_v23 }
 0x27b   : > { %v931_v28 = vsel %vm928_vm13, %v930_v24, %v926_v26  ;;  %1466 = vrcp.f32 %v876_v25  ;;  %vm940_vm0 = vmor %vm938_vm15, %vm939_vm14  ;;  %v959_v38 = vand.u32 2147483648, %v876_v25  ;;  %v957_v49 = vand.u32 2147483647, %v876_v25 }
 0x27c   : > { %1130 = vst [vmem:[%s1829_s8 + $0x10] sm:$0xff] %v931_v28  ;;  %v935_v29 = vsub.f32 1.0, %v934_v27  ;;  %vm953_vm3 = vweird.f32 %v876_v25 }
 0x27d   : > { %v799_v31 = vpop.f32.mrf.mxu3  ;;  %v960_v55 = vor.u32 1.1754944e-38, %v959_v38  ;;  %vm958_vm5 = vcmp.eq.f32.partialorder %v957_v49, 8.507059e+37 }
 0x27e   : > { %v936_v33 = vmul.f32 %v1463_v23, %v935_v29  ;;  %v800_v35 = vadd.f32 %v1820_v32, %v799_v31 }
 0x280   : > { %v1465_v36 = vpop.eup %1464  ;;  %v937_v37 = vadd.f32 %v1463_v23, %v936_v33  ;;  %v1360_v39 = vmul.f32 -1.442695, %v800_v35 }
 0x281   : > { %v1467_v41 = vpop.eup %1466  ;;  %v877_v43 = vadd.f32 1.0, %v1465_v36 }
 0x282   : > { %v941_v44 = vsel %vm940_vm0, %v1463_v23, %v937_v37  ;;  %v949_v45 = vmul.f32 %v1467_v41, %v876_v25  ;;  %1468 = vpow2.f32 %v1360_v39  ;;  %vm954_vm2 = vweird.f32 %v1467_v41 }
 0x283   : > { %v946_v46 = vsel %vm943_vm1, %v945_v42, %v941_v44  ;;  %1470 = vrcp.f32 %v877_v43  ;;  %vm955_vm4 = vmor %vm953_vm3, %vm954_vm2  ;;  %v974_v61 = vand.u32 2147483648, %v877_v43  ;;  %v972_v0 = vand.u32 2147483647, %v877_v43 }
 0x284   : > { %1131 = vst [vmem:[%s1829_s8 + $0x18] sm:$0xff] %v946_v46  ;;  %v950_v40 = vsub.f32 1.0, %v949_v45  ;;  %vm968_vm7 = vweird.f32 %v877_v43 }
 0x285   : > { %v801_v47 = vpop.f32.mrf.mxu3  ;;  %v975_v6 = vor.u32 1.1754944e-38, %v974_v61  ;;  %vm973_vm9 = vcmp.eq.f32.partialorder %v972_v0, 8.507059e+37 }
 0x286   : > { %v951_v48 = vmul.f32 %v1467_v41, %v950_v40  ;;  %v802_v50 = vadd.f32 %v1820_v32, %v801_v47 }
 0x288   : > { %v1469_v51 = vpop.eup %1468  ;;  %v952_v52 = vadd.f32 %v1467_v41, %v951_v48  ;;  %v1361_v53 = vmul.f32 -1.442695, %v802_v50 }
 0x289   : > { %v1471_v54 = vpop.eup %1470  ;;  %v878_v56 = vadd.f32 1.0, %v1469_v51 }
 0x28a   : > { %v956_v57 = vsel %vm955_vm4, %v1467_v41, %v952_v52  ;;  %v964_v58 = vmul.f32 %v1471_v54, %v877_v43  ;;  %1472 = vpow2.f32 %v1361_v53  ;;  %vm969_vm6 = vweird.f32 %v1471_v54 }
 0x28b   : > { %v961_v59 = vsel %vm958_vm5, %v960_v55, %v956_v57  ;;  %1474 = vrcp.f32 %v878_v56  ;;  %vm970_vm8 = vmor %vm968_vm7, %vm969_vm6  ;;  %v989_v12 = vand.u32 2147483648, %v878_v56  ;;  %v987_v15 = vand.u32 2147483647, %v878_v56 }
 0x28c   : > { %1132 = vst [vmem:[%s1829_s8 + $0x20] sm:$0xff] %v961_v59  ;;  %v965_v60 = vsub.f32 1.0, %v964_v58  ;;  %vm983_vm11 = vweird.f32 %v878_v56 }
 0x28d   : > { %v804_v62 = vpop.f32.mrf.mxu3  ;;  %v990_v21 = vor.u32 1.1754944e-38, %v989_v12  ;;  %vm988_vm13 = vcmp.eq.f32.partialorder %v987_v15, 8.507059e+37 }
 0x28e   : > { %v966_v63 = vmul.f32 %v1471_v54, %v965_v60  ;;  %v805_v1 = vadd.f32 %v1820_v32, %v804_v62 }
 0x290   : > { %v1473_v2 = vpop.eup %1472  ;;  %v967_v3 = vadd.f32 %v1471_v54, %v966_v63  ;;  %v1362_v4 = vmul.f32 -1.442695, %v805_v1 }
 0x291   : > { %v1475_v5 = vpop.eup %1474  ;;  %v879_v7 = vadd.f32 1.0, %v1473_v2 }
 0x292   : > { %v971_v8 = vsel %vm970_vm8, %v1471_v54, %v967_v3  ;;  %v979_v9 = vmul.f32 %v1475_v5, %v878_v56  ;;  %1476 = vpow2.f32 %v1362_v4  ;;  %vm984_vm10 = vweird.f32 %v1475_v5 }
 0x293   : > { %v976_v10 = vsel %vm973_vm9, %v975_v6, %v971_v8  ;;  %1478 = vrcp.f32 %v879_v7  ;;  %vm985_vm12 = vmor %vm983_vm11, %vm984_vm10  ;;  %v1004_v27 = vand.u32 2147483648, %v879_v7  ;;  %v1002_v30 = vand.u32 2147483647, %v879_v7 }
 0x294   : > { %1133 = vst [vmem:[%s1829_s8 + $0x28] sm:$0xff] %v976_v10  ;;  %v980_v11 = vsub.f32 1.0, %v979_v9  ;;  %vm998_vm15 = vweird.f32 %v879_v7 }
 0x295   : > { %v806_v13 = vpop.f32.mrf.mxu3  ;;  %v1005_v37 = vor.u32 1.1754944e-38, %v1004_v27  ;;  %vm1003_vm1 = vcmp.eq.f32.partialorder %v1002_v30, 8.507059e+37 }
 0x296   : > { %v981_v14 = vmul.f32 %v1475_v5, %v980_v11  ;;  %v807_v16 = vadd.f32 %v1820_v32, %v806_v13 }
 0x298   : > { %v1477_v17 = vpop.eup %1476  ;;  %v982_v18 = vadd.f32 %v1475_v5, %v981_v14  ;;  %v1363_v19 = vmul.f32 -1.442695, %v807_v16 }
 0x299   : > { %v1479_v20 = vpop.eup %1478  ;;  %v880_v22 = vadd.f32 1.0, %v1477_v17 }
 0x29a   : > { %v986_v23 = vsel %vm985_vm12, %v1475_v5, %v982_v18  ;;  %v994_v24 = vmul.f32 %v1479_v20, %v879_v7  ;;  %1480 = vpow2.f32 %v1363_v19  ;;  %vm999_vm14 = vweird.f32 %v1479_v20 }
 0x29b   : > { %v991_v25 = vsel %vm988_vm13, %v990_v21, %v986_v23  ;;  %1482 = vrcp.f32 %v880_v22  ;;  %vm1000_vm0 = vmor %vm998_vm15, %vm999_vm14  ;;  %v1019_v45 = vand.u32 2147483648, %v880_v22  ;;  %v1017_v38 = vand.u32 2147483647, %v880_v22 }
 0x29c   : > { %1134 = vst [vmem:[%s1829_s8 + $0x30] sm:$0xff] %v991_v25  ;;  %v995_v26 = vsub.f32 1.0, %v994_v24  ;;  %vm1013_vm3 = vweird.f32 %v880_v22 }
 0x29d   : > { %v809_v28 = vpop.f32.mrf.mxu3  ;;  %v1020_v52 = vor.u32 1.1754944e-38, %v1019_v45  ;;  %vm1018_vm5 = vcmp.eq.f32.partialorder %v1017_v38, 8.507059e+37 }
 0x29e   : > { %v996_v29 = vmul.f32 %v1479_v20, %v995_v26  ;;  %v810_v31 = vadd.f32 %v1820_v32, %v809_v28 }
 0x2a0   : > { %v1481_v33 = vpop.eup %1480  ;;  %v997_v34 = vadd.f32 %v1479_v20, %v996_v29  ;;  %v1364_v35 = vmul.f32 -1.442695, %v810_v31 }
 0x2a1   : > { %v1483_v36 = vpop.eup %1482  ;;  %v881_v39 = vadd.f32 1.0, %v1481_v33 }
 0x2a2   : > { %v1001_v41 = vsel %vm1000_vm0, %v1479_v20, %v997_v34  ;;  %v1009_v42 = vmul.f32 %v1483_v36, %v880_v22  ;;  %1484 = vpow2.f32 %v1364_v35  ;;  %vm1014_vm2 = vweird.f32 %v1483_v36 }
 0x2a3   : > { %v1006_v43 = vsel %vm1003_vm1, %v1005_v37, %v1001_v41  ;;  %1486 = vrcp.f32 %v881_v39  ;;  %vm1015_vm4 = vmor %vm1013_vm3, %vm1014_vm2  ;;  %v1034_v58 = vand.u32 2147483648, %v881_v39  ;;  %v1032_v61 = vand.u32 2147483647, %v881_v39 }
 0x2a4   : > { %1135 = vst [vmem:[%s1829_s8 + $0x38] sm:$0xff] %v1006_v43  ;;  %v1010_v44 = vsub.f32 1.0, %v1009_v42  ;;  %vm1028_vm7 = vweird.f32 %v881_v39 }
 0x2a5   : > { %v811_v46 = vpop.f32.mrf.mxu3  ;;  %v1035_v3 = vor.u32 1.1754944e-38, %v1034_v58  ;;  %vm1033_vm9 = vcmp.eq.f32.partialorder %v1032_v61, 8.507059e+37 }
 0x2a6   : > { %v1011_v40 = vmul.f32 %v1483_v36, %v1010_v44  ;;  %v812_v47 = vadd.f32 %v1820_v32, %v811_v46 }
 0x2a8   : > { %v1485_v48 = vpop.eup %1484  ;;  %v1012_v49 = vadd.f32 %v1483_v36, %v1011_v40  ;;  %v1365_v50 = vmul.f32 -1.442695, %v812_v47 }
 0x2a9   : > { %v1487_v51 = vpop.eup %1486  ;;  %v882_v53 = vadd.f32 1.0, %v1485_v48 }
 0x2aa   : > { %v1016_v54 = vsel %vm1015_vm4, %v1483_v36, %v1012_v49  ;;  %v1024_v55 = vmul.f32 %v1487_v51, %v881_v39  ;;  %1488 = vpow2.f32 %v1365_v50  ;;  %vm1029_vm6 = vweird.f32 %v1487_v51 }
 0x2ab   : > { %v1021_v56 = vsel %vm1018_vm5, %v1020_v52, %v1016_v54  ;;  %1490 = vrcp.f32 %v882_v53  ;;  %vm1030_vm8 = vmor %vm1028_vm7, %vm1029_vm6  ;;  %v1049_v9 = vand.u32 2147483648, %v882_v53  ;;  %v1047_v12 = vand.u32 2147483647, %v882_v53 }
 0x2ac   : > { %1136 = vst [vmem:[%s1829_s8 + $0x40] sm:$0xff] %v1021_v56  ;;  %v1025_v57 = vsub.f32 1.0, %v1024_v55  ;;  %vm1043_vm11 = vweird.f32 %v882_v53 }
 0x2ad   : > { %v814_v59 = vpop.f32.mrf.mxu3  ;;  %v1050_v18 = vor.u32 1.1754944e-38, %v1049_v9  ;;  %vm1048_vm13 = vcmp.eq.f32.partialorder %v1047_v12, 8.507059e+37 }
 0x2ae   : > { %v1026_v60 = vmul.f32 %v1487_v51, %v1025_v57  ;;  %v815_v62 = vadd.f32 %v1820_v32, %v814_v59 }
 0x2b0   : > { %v1489_v63 = vpop.eup %1488  ;;  %v1027_v0 = vadd.f32 %v1487_v51, %v1026_v60  ;;  %v1366_v1 = vmul.f32 -1.442695, %v815_v62 }
 0x2b1   : > { %v1491_v2 = vpop.eup %1490  ;;  %v883_v4 = vadd.f32 1.0, %v1489_v63 }
 0x2b2   : > { %v1031_v5 = vsel %vm1030_vm8, %v1487_v51, %v1027_v0  ;;  %v1039_v6 = vmul.f32 %v1491_v2, %v882_v53  ;;  %1492 = vpow2.f32 %v1366_v1  ;;  %vm1044_vm10 = vweird.f32 %v1491_v2 }
 0x2b3   : > { %v1036_v7 = vsel %vm1033_vm9, %v1035_v3, %v1031_v5  ;;  %1494 = vrcp.f32 %v883_v4  ;;  %vm1045_vm12 = vmor %vm1043_vm11, %vm1044_vm10  ;;  %v1064_v24 = vand.u32 2147483648, %v883_v4  ;;  %v1062_v27 = vand.u32 2147483647, %v883_v4 }
 0x2b4   : > { %1137 = vst [vmem:[%s1829_s8 + $0x48] sm:$0xff] %v1036_v7  ;;  %v1040_v8 = vsub.f32 1.0, %v1039_v6  ;;  %vm1058_vm15 = vweird.f32 %v883_v4 }
 0x2b5   : > { %v816_v10 = vpop.f32.mrf.mxu3  ;;  %v1065_v34 = vor.u32 1.1754944e-38, %v1064_v24  ;;  %vm1063_vm1 = vcmp.eq.f32.partialorder %v1062_v27, 8.507059e+37 }
 0x2b6   : > { %v1041_v11 = vmul.f32 %v1491_v2, %v1040_v8  ;;  %v817_v13 = vadd.f32 %v1820_v32, %v816_v10 }
 0x2b8   : > { %v1493_v14 = vpop.eup %1492  ;;  %v1042_v15 = vadd.f32 %v1491_v2, %v1041_v11  ;;  %v1367_v16 = vmul.f32 -1.442695, %v817_v13 }
 0x2b9   : > { %v1495_v17 = vpop.eup %1494  ;;  %v884_v19 = vadd.f32 1.0, %v1493_v14 }
 0x2ba   : > { %v1046_v20 = vsel %vm1045_vm12, %v1491_v2, %v1042_v15  ;;  %v1054_v21 = vmul.f32 %v1495_v17, %v883_v4  ;;  %1496 = vpow2.f32 %v1367_v16  ;;  %vm1059_vm14 = vweird.f32 %v1495_v17 }
 0x2bb   : > { %v1051_v22 = vsel %vm1048_vm13, %v1050_v18, %v1046_v20  ;;  %1498 = vrcp.f32 %v884_v19  ;;  %vm1060_vm0 = vmor %vm1058_vm15, %vm1059_vm14  ;;  %v1079_v42 = vand.u32 2147483648, %v884_v19  ;;  %v1077_v45 = vand.u32 2147483647, %v884_v19 }
 0x2bc   : > { %1138 = vst [vmem:[%s1829_s8 + $0x50] sm:$0xff] %v1051_v22  ;;  %v1055_v23 = vsub.f32 1.0, %v1054_v21  ;;  %vm1073_vm3 = vweird.f32 %v884_v19 }
 0x2bd   : > { %v819_v25 = vpop.f32.mrf.mxu3  ;;  %v1080_v49 = vor.u32 1.1754944e-38, %v1079_v42  ;;  %vm1078_vm5 = vcmp.eq.f32.partialorder %v1077_v45, 8.507059e+37 }
 0x2be   : > { %v1056_v26 = vmul.f32 %v1495_v17, %v1055_v23  ;;  %v820_v28 = vadd.f32 %v1820_v32, %v819_v25 }
 0x2c0   : > { %v1497_v29 = vpop.eup %1496  ;;  %v1057_v30 = vadd.f32 %v1495_v17, %v1056_v26  ;;  %v1368_v31 = vmul.f32 -1.442695, %v820_v28 }
 0x2c1   : > { %v1499_v33 = vpop.eup %1498  ;;  %v885_v35 = vadd.f32 1.0, %v1497_v29 }
 0x2c2   : > { %v1061_v36 = vsel %vm1060_vm0, %v1495_v17, %v1057_v30  ;;  %v1069_v37 = vmul.f32 %v1499_v33, %v884_v19  ;;  %1500 = vpow2.f32 %v1368_v31  ;;  %vm1074_vm2 = vweird.f32 %v1499_v33 }
 0x2c3   : > { %v1066_v39 = vsel %vm1063_vm1, %v1065_v34, %v1061_v36  ;;  %1502 = vrcp.f32 %v885_v35  ;;  %vm1075_vm4 = vmor %vm1073_vm3, %vm1074_vm2  ;;  %v1094_v55 = vand.u32 2147483648, %v885_v35  ;;  %vm1088_vm7 = vweird.f32 %v885_v35 }
 0x2c4   : > { %1139 = vst [vmem:[%s1829_s8 + $0x58] sm:$0xff] %v1066_v39  ;;  %v1070_v41 = vsub.f32 1.0, %v1069_v37 }
 0x2c5   : > { %v821_v43 = vpop.f32.mrf.mxu3  ;;  %v1095_v60 = vor.u32 1.1754944e-38, %v1094_v55 }
 0x2c6   : > { %v1071_v44 = vmul.f32 %v1499_v33, %v1070_v41  ;;  %v822_v46 = vadd.f32 %v1820_v32, %v821_v43  ;;  %v1092_v32 = vand.u32 2147483647, %v885_v35 }
 0x2c8   : > { %v1501_v40 = vpop.eup %1500  ;;  %v1072_v38 = vadd.f32 %v1499_v33, %v1071_v44  ;;  %v1369_v47 = vmul.f32 -1.442695, %v822_v46  ;;  %vm1093_vm9 = vcmp.eq.f32.partialorder %v1092_v32, 8.507059e+37 }
 0x2c9   : > { %v1503_v48 = vpop.eup %1502  ;;  %v886_v50 = vadd.f32 1.0, %v1501_v40 }
 0x2ca   : > { %v1076_v51 = vsel %vm1075_vm4, %v1499_v33, %v1072_v38  ;;  %v1084_v52 = vmul.f32 %v1503_v48, %v885_v35  ;;  %1504 = vpow2.f32 %v1369_v47  ;;  %vm1089_vm6 = vweird.f32 %v1503_v48 }
 0x2cb   : > { %v1081_v53 = vsel %vm1078_vm5, %v1080_v49, %v1076_v51  ;;  %1506 = vrcp.f32 %v886_v50  ;;  %vm1090_vm8 = vmor %vm1088_vm7, %vm1089_vm6  ;;  %v1109_v2 = vand.u32 2147483648, %v886_v50  ;;  %v1107_v4 = vand.u32 2147483647, %v886_v50 }
 0x2cc   : > { %1140 = vst [vmem:[%s1829_s8 + $0x60] sm:$0xff] %v1081_v53  ;;  %v1085_v54 = vsub.f32 1.0, %v1084_v52  ;;  %vm1103_vm11 = vweird.f32 %v886_v50 }
 0x2cd   : > { %v1110_v7 = vor.u32 1.1754944e-38, %v1109_v2  ;;  %vm1108_vm13 = vcmp.eq.f32.partialorder %v1107_v4, 8.507059e+37 }
 0x2ce   : > { %v1086_v56 = vmul.f32 %v1503_v48, %v1085_v54 }
 0x2d0   : > { %v1505_v57 = vpop.eup %1504  ;;  %v1087_v58 = vadd.f32 %v1503_v48, %v1086_v56 }
 0x2d1   : > { %v1507_v59 = vpop.eup %1506  ;;  %v887_v61 = vadd.f32 1.0, %v1505_v57 }
 0x2d2   : > { %v1091_v62 = vsel %vm1090_vm8, %v1503_v48, %v1087_v58  ;;  %v1099_v63 = vmul.f32 %v1507_v59, %v886_v50  ;;  %vm1104_vm10 = vweird.f32 %v1507_v59 }
 0x2d3   : > { %v1096_v0 = vsel %vm1093_vm9, %v1095_v60, %v1091_v62  ;;  %1508 = vrcp.f32 %v887_v61  ;;  %vm1105_vm12 = vmor %vm1103_vm11, %vm1104_vm10  ;;  %v1124_v12 = vand.u32 2147483648, %v887_v61  ;;  %v1122_v14 = vand.u32 2147483647, %v887_v61 }
 0x2d4   : > { %1141 = vst [vmem:[%s1829_s8 + $0x68] sm:$0xff] %v1096_v0  ;;  %v1100_v1 = vsub.f32 1.0, %v1099_v63  ;;  %vm1118_vm15 = vweird.f32 %v887_v61 }
 0x2d5   : > { %v1125_v16 = vor.u32 1.1754944e-38, %v1124_v12  ;;  %vm1123_vm1 = vcmp.eq.f32.partialorder %v1122_v14, 8.507059e+37 }
 0x2d6   : > { %v1101_v3 = vmul.f32 %v1507_v59, %v1100_v1 }
 0x2d8   : > { %v1102_v5 = vadd.f32 %v1507_v59, %v1101_v3 }
 0x2d9   : > { %v1509_v6 = vpop.eup %1508 }
 0x2da   : > { %v1106_v8 = vsel %vm1105_vm12, %v1507_v59, %v1102_v5  ;;  %v1114_v9 = vmul.f32 %v1509_v6, %v887_v61  ;;  %vm1119_vm14 = vweird.f32 %v1509_v6 }
 0x2db   : > { %v1111_v10 = vsel %vm1108_vm13, %v1110_v7, %v1106_v8  ;;  %vm1120_vm0 = vmor %vm1118_vm15, %vm1119_vm14 }
 0x2dc   : > { %1142 = vst [vmem:[%s1829_s8 + $0x70] sm:$0xff] %v1111_v10  ;;  %v1115_v11 = vsub.f32 1.0, %v1114_v9 }
 0x2de   : > { %v1116_v13 = vmul.f32 %v1509_v6, %v1115_v11 }
 0x2e0   : > { %v1117_v15 = vadd.f32 %v1509_v6, %v1116_v13 }
 0x2e2   : > { %v1121_v17 = vsel %vm1120_vm0, %v1509_v6, %v1117_v15 }
 0x2e3   : > { %v1126_v18 = vsel %vm1123_vm1, %v1125_v16, %v1121_v17 }
 0x2e4   : > { %1143 = vst [vmem:[%s1829_s8 + $0x78] sm:$0xff] %v1126_v18 }
 0x2e5   : > { %1537 = shalt.err (!%p1534_p3)
}
 0x2e6   : > { %s1574_s23 = smov 128   ;;  %s1575_s8 = smov 8  }
 0x2e7   : > { %1401 = dma.vmem_to_hbm [thread:$0]  (%p1654_p5), %s1158_s28, 2048, %s1160_s15, %s1145_s16, %s1574_s23, %s1574_s23, %s1575_s8  }
 0x2e8 PF: > { %p1407_p4 = scmp.ge.s32.totalorder %s1572_s27, 2  ;;  %s1174_s21 = sand.u32 1, %s1560_s24  }
 0x2e9   : > { %s1175_s13 = scalar_lea.sflag [#allocation3], %s1174_s21 }
 0x2ea   : > { %p1404_p7 = pnand %p1407_p4, %p1658_p6 }
 0x2ec   : > { %p1405_p8 = pneg %p1404_p7 }
 0x2ee   : > { %1555 = dma.done.wait (%p1405_p8), %s1175_s13, 2048  }
 0x2ef   : > { %1557 = vsyncadd (%p1405_p8), %s1175_s13, 4294965248  ;;  %p17_p9 = scmp.ge.s32.totalorder %s1641_s30, 4   ;;  %s1903_s24 = smov %s1564_s25 }
 0x2f0   : > { %s1904_s25 = smov %s1568_s26  ;;  %s1905_s26 = smov %s1652_s10 }
 0x2f1   : > { %s1906_s27 = smov %s1641_s30  ;;  %19 = sbr.rel (!%p17_p9) target bundleno = 3 (0x3), region = 85 }
 0x2f6   :  { %1181 = vsyncpa [#allocation3], 1 }
 0x2f7   :  { %1183 = vsyncpa [#allocation3 + $0x1], 1 }

// kernel: tpu_custom_call.1
= control target key start
LH: loop header
LB: loop body
LE: loop exit
PB: predicated region body
PF: predicated region fallthrough
CT: control target
= control target key end

     0   :  { %12 = vsyncpa [#allocation3], 0  ;;  %s1893_s0 = inlined_call_operand.vmem [shape: f32[256,24], index: 0, kind: input, shape index: {}]   ;;  %s1894_s1 = inlined_call_operand.vmem [shape: bf16[24,128], index: 1, kind: input, shape index: {}]   ;;  %s1895_s2 = inlined_call_operand.vmem [shape: f32[1,128], index: 2, kind: input, shape index: {}]   ;;  %s1896_s3 = inlined_call_operand.vmem [shape: bf16[2,128,128], index: 3, kind: input, shape index: {}]   ;;  %s1897_s4 = inlined_call_operand.vmem [shape: f32[2,1,128], index: 4, kind: input, shape index: {}]   ;;  %s1898_s5 = inlined_call_operand.vmem [shape: bf16[128,128], index: 5, kind: input, shape index: {}]   ;;  %s1899_s6 = inlined_call_operand.vmem [shape: f32[1,128], index: 6, kind: input, shape index: {}]   ;;  %s1900_s7 = inlined_call_operand.hbm [shape: f32[256,128], index: 7, kind: output, shape index: {}]  }
   0x1   :  { %14 = vsyncpa [#allocation3 + $0x1], 0  ;;  %s1616_s24 = smov 0   ;;  %s1618_s25 = smov 0  }
   0x2   :  { %s1620_s26 = smov 0   ;;  %s1622_s27 = smov 0  }
   0x3 LB: > { %s1637_s28 = sadd.s32 4294967295, %s1572_s27   ;;  %s1222_s29 = sadd.s32 4294967294, %s1572_s27   ;;  %s1572_s27 = sphi %s1622_s27, %s1906_s27   ;;  %s1568_s26 = sphi %s1620_s26, %s1905_s26   ;;  %s1564_s25 = sphi %s1618_s25, %s1904_s25   ;;  %s1560_s24 = sphi %s1616_s24, %s1903_s24  }
   0x4   : > { %s1641_s30 = sadd.s32 1, %s1572_s27   ;;  %s179_s8 = sadd.s32 1, %s1568_s26 }
   0x5   : > { %s176_s9 = ssub.s32 %s1572_s27, %s1641_s30  ;;  %p189_p0 = scmp.ne.s32.totalorder %s1568_s26, %s1564_s25 }
   0x6   : > { %p177_p1 = scmp.eq.s32.totalorder %s176_s9, 0  ;;  %p190_p2 = scmp.eq.s32.totalorder %s1637_s28, 1 }
   0x7   : > { %p195_p3 = scmp.ne.s32.totalorder %s1564_s25, %s1560_s24  ;;  %p196_p4 = scmp.eq.s32.totalorder %s1222_s29, 1 }
   0x8   : > { %s1652_s10 = scalar_select %p177_p1, %s1568_s26, %s179_s8  }
   0x9   : > { %p1654_p5 = por %p190_p2, %p189_p0  ;;  %p1658_p6 = por %p196_p4, %p195_p3 }
   0xa   : > { %p1225_p7 = scmp.ge.s32.totalorder %s1572_s27, 1  ;;  %p241_p8 = scmp.lt.s32.totalorder %s1572_s27, 3 }
   0xc   : > { %p242_p9 = pnand %p1225_p7, %p241_p8 }
   0xd   : > { %s1227_s15 = sshll.u32 (!%p242_p9), %s1637_s28, 4  ;;  %s270_s23 = sand.u32 (!%p242_p9), 1, %s1564_s25  }
   0xe   : > { %245 = sbr.rel (%p242_p9) target bundleno = 744 (0x2e8), region = 48  ;;  %p274_p10 = scmp.lt.s32.totalorder (!%p242_p9), %s1227_s15, 31 }
   0xf   : > { %s1226_s29 = sshll.u32 (!%p242_p9), %s270_s23, 7  ;;  %s1400_s9 = sshll.u32 (!%p242_p9), %s1637_s28, 7 }
  0x10   : > { %s1829_s8 = scalar_lea.vmem (!%p242_p9), [#allocation2], %s1226_s29  ;;  %s1156_s14 = scalar_lea.hbm (!%p242_p9), %s1900_s7, %s1400_s9 }
  0x11   : > { %s1157_s28 = sshll.u32 (!%p242_p9), %s1829_s8, 4  ;;  %s1530_s22 = scalar_lea.hbm (!%p242_p9), %s1900_s7, 256  ;;  %s1158_s28 = int_to_ptr.vmem [resolvable:$true] %s1157_s28 }
  0x13   : > { %v307_v0 = vld [vmem:[%s1894_s1 + $0x8] sm:$0xf]  ;;  %vm346_vm0 = vcmask 1043456   ;;  %s1908_s15 = smov (!%p274_p10, %s1227_s15), 31  ;;  %v1375_v4 = vld [vmem:[%s1894_s1] sm:$0xff]  ;;  %vm321_vm1 = vcmask 195584  }
  0x14   : > { %v317_v1 = vunpack.c.l.b16 %v307_v0  ;;  %s1228_s16 = sshll.u32 %s1908_s15, 3  ;;  %v1383_v20 = vld [vmem:[%s1896_s3 + $0x38] sm:$0xff]  ;;  %v1382_v24 = vld [vmem:[%s1896_s3 + $0x30] sm:$0xff]  ;;  %v1381_v25 = vld [vmem:[%s1896_s3 + $0x28] sm:$0xff]  ;;  %s1159_s15 = sshll.u32 %s1156_s14, 4  ;;  %s1160_s15 = int_to_ptr.hbm [resolvable:$true] %s1159_s15 }
  0x15   : > { %s1674_s21 = scalar_lea.vmem %s1893_s0, %s1228_s16  ;;  %491 = vmatpush.bf16.msra.mxu1 %v1383_v20  ;;  %v1380_v26 = vld [vmem:[%s1896_s3 + $0x20] sm:$0xff]  ;;  %v1379_v29 = vld [vmem:[%s1896_s3 + $0x18] sm:$0xff]  ;;  %v1378_v31 = vld [vmem:[%s1896_s3 + $0x10] sm:$0xff]  ;;  %s1145_s16 = scalar_lea.sflag [#allocation3], %s270_s23 }
  0x16   : > { %v319_v2 = vpack.c.b16 %v317_v1, %v317_v1  ;;  %v281_v5 = vld [vmem:[%s1674_s21] sm:$0xff]  ;;  %v282_v6 = vld [vmem:[%s1674_s21 + $0x8] sm:$0xff]  ;;  %v283_v8 = vld [vmem:[%s1674_s21 + $0x10] sm:$0xff]  ;;  %s1524_s17 = sshra.s32 %s1160_s15, 4  ;;  %s1525_s17 = int_to_ptr.hbm [resolvable:$true] %s1524_s17 }
  0x17   : > { %v297_v7 = vpack.c.bf16 %v282_v6, %v281_v5  ;;  %v284_v9 = vld [vmem:[%s1674_s21 + $0x18] sm:$0xff]  ;;  %v285_v11 = vld [vmem:[%s1674_s21 + $0x20] sm:$0xff]  ;;  %v286_v12 = vld [vmem:[%s1674_s21 + $0x28] sm:$0xff]  ;;  %s1526_s18 = scalar_lea.hbm %s1525_s17, 128  ;;  %p1531_p0 = scmp.lt.s32.totalorder %s1525_s17, %s1900_s7 }
  0x18   : > { %v348_v3 = vsel %vm346_vm0, %v319_v2, 0  ;;  %v298_v10 = vpack.c.bf16 %v284_v9, %v283_v8  ;;  %v299_v13 = vpack.c.bf16 %v286_v12, %v285_v11  ;;  %v287_v14 = vld [vmem:[%s1674_s21 + $0x30] sm:$0xff]  ;;  %v288_v15 = vld [vmem:[%s1674_s21 + $0x38] sm:$0xff]  ;;  %v289_v17 = vld [vmem:[%s1674_s21 + $0x40] sm:$0xff]  ;;  %p1527_p11 = scmp.ne.s32.totalorder %s1525_s17, %s1526_s18  ;;  %p1532_p1 = scmp.lt.s32.totalorder %s1530_s22, %s1526_s18 }
  0x19   : > { %356 = vmatpush.bf16.msra.mxu0 %v348_v3  ;;  %v300_v16 = vpack.c.bf16 %v288_v15, %v287_v14  ;;  %v290_v18 = vld [vmem:[%s1674_s21 + $0x48] sm:$0xff]  ;;  %v291_v21 = vld [vmem:[%s1674_s21 + $0x50] sm:$0xff]  ;;  %v292_v22 = vld [vmem:[%s1674_s21 + $0x58] sm:$0xff]  ;;  %492 = vmatpush.bf16.msra.mxu1 %v1382_v24 }
  0x1a   : > { %v301_v19 = vpack.c.bf16 %v290_v18, %v289_v17  ;;  %v302_v23 = vpack.c.bf16 %v292_v22, %v291_v21  ;;  %v293_v27 = vld [vmem:[%s1674_s21 + $0x60] sm:$0xff]  ;;  %v294_v28 = vld [vmem:[%s1674_s21 + $0x68] sm:$0xff]  ;;  %v295_v34 = vld [vmem:[%s1674_s21 + $0x70] sm:$0xff]  ;;  %p1528_p12 = pnand %p1527_p11, %p1654_p5  ;;  %p1533_p2 = por %p1532_p1, %p1531_p0 }
  0x1b   : > { %v303_v30 = vpack.c.bf16 %v294_v28, %v293_v27  ;;  %v1377_v32 = vld [vmem:[%s1896_s3 + $0x8] sm:$0xff]  ;;  %v1376_v33 = vld [vmem:[%s1896_s3] sm:$0xff]  ;;  %v296_v35 = vld [vmem:[%s1674_s21 + $0x78] sm:$0xff] }
  0x1c   : > { %v304_v36 = vpack.c.bf16 %v296_v35, %v295_v34  ;;  %v1727_v38 = vld [vmem:[%s1895_s2] ss:$0 sm:$0xff]  ;;  %v1390_v17 = vld [vmem:[%s1896_s3 + $0x70] sm:$0xff]  ;;  %v1387_v24 = vld [vmem:[%s1896_s3 + $0x58] sm:$0xff]  ;;  %p1529_p13 = pneg %p1528_p12 }
  0x1d   : > { %357 = vmatpush.bf16.msra.mxu0 %v1375_v4  ;;  %493 = vmatpush.bf16.msra.mxu1 %v1381_v25  ;;  %v1388_v20 = vld [vmem:[%s1896_s3 + $0x60] sm:$0xff]  ;;  %v1386_v28 = vld [vmem:[%s1896_s3 + $0x50] sm:$0xff] }
  0x1e   : > { %p1534_p3 = pnand %p1533_p2, %p1529_p13 }
  0x20   : > { %1233 = vmatmul.msk.bf16.vlgmr.msra.gmra.mxu0 %vm321_vm1, %v297_v7 }
  0x21   : > { %494 = vmatpush.bf16.msra.mxu1 %v1380_v26 }
  0x25   : > { %495 = vmatpush.bf16.msra.mxu1 %v1379_v29 }
  0x29   : > { %496 = vmatpush.bf16.msra.mxu1 %v1378_v31  ;;  %v1384_v31 = vld [vmem:[%s1896_s3 + $0x40] sm:$0xff] }
  0x2d   : > { %497 = vmatpush.bf16.msra.mxu1 %v1377_v32 }
  0x30   : > { %1234 = vmatmul.msk.bf16.gmra.mxu0 %vm321_vm1, %v298_v10 }
  0x31   : > { %498 = vmatpush.bf16.msra.mxu1 %v1376_v33 }
  0x40   : > { %1235 = vmatmul.msk.bf16.gmra.mxu0 %vm321_vm1, %v299_v13  ;;  %v1391_v13 = vld [vmem:[%s1896_s3 + $0x78] sm:$0xff] }
  0x41   : > { %634 = vmatpush.bf16.msra.mxu2 %v1391_v13 }
  0x45   : > { %635 = vmatpush.bf16.msra.mxu2 %v1390_v17  ;;  %v1399_v17 = vld [vmem:[%s1898_s5 + $0x38] sm:$0xff] }
  0x46   : > { %775 = vmatpush.bf16.msra.mxu3 %v1399_v17 }
  0x50   : > { %1236 = vmatmul.msk.bf16.gmra.mxu0 %vm321_vm1, %v300_v16 }
  0x60   : > { %1237 = vmatmul.msk.bf16.gmra.mxu0 %vm321_vm1, %v301_v19  ;;  %v1389_v19 = vld [vmem:[%s1896_s3 + $0x68] sm:$0xff] }
  0x61   : > { %636 = vmatpush.bf16.msra.mxu2 %v1389_v19  ;;  %v1398_v19 = vld [vmem:[%s1898_s5 + $0x30] sm:$0xff] }
  0x62   : > { %776 = vmatpush.bf16.msra.mxu3 %v1398_v19 }
  0x65   : > { %637 = vmatpush.bf16.msra.mxu2 %v1388_v20  ;;  %v1397_v20 = vld [vmem:[%s1898_s5 + $0x28] sm:$0xff] }
  0x66   : > { %777 = vmatpush.bf16.msra.mxu3 %v1397_v20 }
  0x69   : > { %638 = vmatpush.bf16.msra.mxu2 %v1387_v24  ;;  %v1396_v24 = vld [vmem:[%s1898_s5 + $0x20] sm:$0xff] }
  0x6a   : > { %778 = vmatpush.bf16.msra.mxu3 %v1396_v24 }
  0x6d   : > { %639 = vmatpush.bf16.msra.mxu2 %v1386_v28 }
  0x70   : > { %1238 = vmatmul.msk.bf16.gmra.mxu0 %vm321_vm1, %v302_v23 }
  0x80   : > { %1239 = vmatmul.msk.bf16.gmra.mxu0 %vm321_vm1, %v303_v30  ;;  %v1385_v30 = vld [vmem:[%s1896_s3 + $0x48] sm:$0xff] }
  0x81   : > { %640 = vmatpush.bf16.msra.mxu2 %v1385_v30  ;;  %v1394_v30 = vld [vmem:[%s1898_s5 + $0x10] sm:$0xff] }
  0x85   : > { %641 = vmatpush.bf16.msra.mxu2 %v1384_v31 }
  0x90   : > { %1240 = vmatmul.msk.bf16.gmra.mxu0 %vm321_vm1, %v304_v36 }
  0x9d   : > { %v359_v37 = vpop.f32.mrf.mxu0 }
  0x9e   : > { %v360_v39 = vadd.f32 %v1727_v38, %v359_v37 }
  0xa0   : > { %v399_v42 = vmax.f32 %v360_v39, 0.0 }
  0xa5   : > { %v361_v40 = vpop.f32.mrf.mxu0 }
  0xa6   : > { %v362_v41 = vadd.f32 %v1727_v38, %v361_v40  ;;  %v1772_v40 = vld [vmem:[%s1897_s4] ss:$0 sm:$0xff] }
  0xa8   : > { %v400_v43 = vmax.f32 %v362_v41, 0.0 }
  0xaa   : > { %v415_v44 = vpack.c.bf16 %v400_v43, %v399_v42 }
  0xac   : > { %499 = vmatmul.bf16.vlgmr.msra.gmra.mxu1 %v415_v44 }
  0xad   : > { %v364_v45 = vpop.f32.mrf.mxu0 }
  0xae   : > { %v365_v46 = vadd.f32 %v1727_v38, %v364_v45 }
  0xb0   : > { %v401_v49 = vmax.f32 %v365_v46, 0.0 }
  0xb5   : > { %v366_v47 = vpop.f32.mrf.mxu0 }
  0xb6   : > { %v367_v48 = vadd.f32 %v1727_v38, %v366_v47 }
  0xb8   : > { %v402_v50 = vmax.f32 %v367_v48, 0.0 }
  0xba   : > { %v416_v51 = vpack.c.bf16 %v402_v50, %v401_v49 }
  0xbc   : > { %504 = vmatmul.bf16.gmra.mxu1 %v416_v51 }
  0xbd   : > { %v369_v52 = vpop.f32.mrf.mxu0 }
  0xbe   : > { %v370_v53 = vadd.f32 %v1727_v38, %v369_v52 }
  0xc0   : > { %v403_v56 = vmax.f32 %v370_v53, 0.0 }
  0xc5   : > { %v371_v54 = vpop.f32.mrf.mxu0 }
  0xc6   : > { %v372_v55 = vadd.f32 %v1727_v38, %v371_v54 }
  0xc8   : > { %v404_v57 = vmax.f32 %v372_v55, 0.0 }
  0xca   : > { %v417_v58 = vpack.c.bf16 %v404_v57, %v403_v56 }
  0xcc   : > { %509 = vmatmul.bf16.gmra.mxu1 %v417_v58 }
  0xcd   : > { %v374_v59 = vpop.f32.mrf.mxu0 }
  0xce   : > { %v375_v60 = vadd.f32 %v1727_v38, %v374_v59 }
  0xd0   : > { %v405_v63 = vmax.f32 %v375_v60, 0.0 }
  0xd5   : > { %v376_v61 = vpop.f32.mrf.mxu0 }
  0xd6   : > { %v377_v62 = vadd.f32 %v1727_v38, %v376_v61 }
  0xd8   : > { %v406_v0 = vmax.f32 %v377_v62, 0.0 }
  0xda   : > { %v418_v1 = vpack.c.bf16 %v406_v0, %v405_v63 }
  0xdc   : > { %514 = vmatmul.bf16.gmra.mxu1 %v418_v1 }
  0xdd   : > { %v379_v2 = vpop.f32.mrf.mxu0 }
  0xde   : > { %v380_v3 = vadd.f32 %v1727_v38, %v379_v2 }
  0xe0   : > { %v407_v6 = vmax.f32 %v380_v3, 0.0 }
  0xe5   : > { %v381_v4 = vpop.f32.mrf.mxu0 }
  0xe6   : > { %v382_v5 = vadd.f32 %v1727_v38, %v381_v4 }
  0xe8   : > { %v408_v7 = vmax.f32 %v382_v5, 0.0 }
  0xea   : > { %v419_v8 = vpack.c.bf16 %v408_v7, %v407_v6 }
  0xec   : > { %519 = vmatmul.bf16.gmra.mxu1 %v419_v8 }
  0xed   : > { %v384_v9 = vpop.f32.mrf.mxu0 }
  0xee   : > { %v385_v10 = vadd.f32 %v1727_v38, %v384_v9 }
  0xf0   : > { %v409_v14 = vmax.f32 %v385_v10, 0.0 }
  0xf5   : > { %v386_v11 = vpop.f32.mrf.mxu0 }
  0xf6   : > { %v387_v12 = vadd.f32 %v1727_v38, %v386_v11 }
  0xf8   : > { %v410_v15 = vmax.f32 %v387_v12, 0.0 }
  0xfa   : > { %v420_v16 = vpack.c.bf16 %v410_v15, %v409_v14 }
  0xfc   : > { %524 = vmatmul.bf16.gmra.mxu1 %v420_v16 }
  0xfd   : > { %v389_v18 = vpop.f32.mrf.mxu0 }
  0xfe   : > { %v390_v21 = vadd.f32 %v1727_v38, %v389_v18 }
 0x100   : > { %v411_v25 = vmax.f32 %v390_v21, 0.0 }
 0x105   : > { %v391_v22 = vpop.f32.mrf.mxu0 }
 0x106   : > { %v392_v23 = vadd.f32 %v1727_v38, %v391_v22 }
 0x108   : > { %v412_v26 = vmax.f32 %v392_v23, 0.0 }
 0x10a   : > { %v421_v27 = vpack.c.bf16 %v412_v26, %v411_v25 }
 0x10c   : > { %529 = vmatmul.bf16.gmra.mxu1 %v421_v27 }
 0x10d   : > { %v394_v29 = vpop.f32.mrf.mxu0 }
 0x10e   : > { %v395_v32 = vadd.f32 %v1727_v38, %v394_v29  ;;  %v1395_v29 = vld [vmem:[%s1898_s5 + $0x18] sm:$0xff] }
 0x10f   : > { %779 = vmatpush.bf16.msra.mxu3 %v1395_v29 }
 0x110   : > { %v413_v35 = vmax.f32 %v395_v32, 0.0 }
 0x113   : > { %780 = vmatpush.bf16.msra.mxu3 %v1394_v30 }
 0x115   : > { %v396_v33 = vpop.f32.mrf.mxu0 }
 0x116   : > { %v397_v34 = vadd.f32 %v1727_v38, %v396_v33  ;;  %v1393_v33 = vld [vmem:[%s1898_s5 + $0x8] sm:$0xff] }
 0x117   : > { %781 = vmatpush.bf16.msra.mxu3 %v1393_v33 }
 0x118   : > { %v414_v36 = vmax.f32 %v397_v34, 0.0 }
 0x11a   : > { %v422_v37 = vpack.c.bf16 %v414_v36, %v413_v35 }
 0x11c   : > { %534 = vmatmul.bf16.gmra.mxu1 %v422_v37  ;;  %v1392_v37 = vld [vmem:[%s1898_s5] sm:$0xff] }
 0x11d   : > { %782 = vmatpush.bf16.msra.mxu3 %v1392_v37 }
 0x129   : > { %v500_v39 = vpop.f32.mrf.mxu1 }
 0x12a   : > { %v501_v41 = vadd.f32 %v1772_v40, %v500_v39 }
 0x12c   : > { %v540_v44 = vmax.f32 %v501_v41, 0.0 }
 0x131   : > { %v502_v42 = vpop.f32.mrf.mxu1 }
 0x132   : > { %v503_v43 = vadd.f32 %v1772_v40, %v502_v42  ;;  %v1444_v42 = vld [vmem:[%s1897_s4 + $0x1] ss:$0 sm:$0xff] }
 0x134   : > { %v541_v45 = vmax.f32 %v503_v43, 0.0 }
 0x136   : > { %v556_v46 = vpack.c.bf16 %v541_v45, %v540_v44 }
 0x138   : > { %642 = vmatmul.bf16.vlgmr.msra.gmra.mxu2 %v556_v46 }
 0x139   : > { %v505_v38 = vpop.f32.mrf.mxu1 }
 0x13a   : > { %v506_v47 = vadd.f32 %v1772_v40, %v505_v38 }
 0x13c   : > { %v542_v50 = vmax.f32 %v506_v47, 0.0 }
 0x141   : > { %v507_v48 = vpop.f32.mrf.mxu1 }
 0x142   : > { %v508_v49 = vadd.f32 %v1772_v40, %v507_v48 }
 0x144   : > { %v543_v51 = vmax.f32 %v508_v49, 0.0 }
 0x146   : > { %v557_v52 = vpack.c.bf16 %v543_v51, %v542_v50 }
 0x148   : > { %647 = vmatmul.bf16.gmra.mxu2 %v557_v52 }
 0x149   : > { %v510_v53 = vpop.f32.mrf.mxu1 }
 0x14a   : > { %v511_v54 = vadd.f32 %v1772_v40, %v510_v53 }
 0x14c   : > { %v544_v57 = vmax.f32 %v511_v54, 0.0 }
 0x151   : > { %v512_v55 = vpop.f32.mrf.mxu1 }
 0x152   : > { %v513_v56 = vadd.f32 %v1772_v40, %v512_v55 }
 0x154   : > { %v545_v58 = vmax.f32 %v513_v56, 0.0 }
 0x156   : > { %v558_v59 = vpack.c.bf16 %v545_v58, %v544_v57 }
 0x158   : > { %652 = vmatmul.bf16.gmra.mxu2 %v558_v59 }
 0x159   : > { %v515_v60 = vpop.f32.mrf.mxu1 }
 0x15a   : > { %v516_v61 = vadd.f32 %v1772_v40, %v515_v60 }
 0x15c   : > { %v546_v0 = vmax.f32 %v516_v61, 0.0 }
 0x161   : > { %v517_v62 = vpop.f32.mrf.mxu1 }
 0x162   : > { %v518_v63 = vadd.f32 %v1772_v40, %v517_v62 }
 0x164   : > { %v547_v1 = vmax.f32 %v518_v63, 0.0 }
 0x166   : > { %v559_v2 = vpack.c.bf16 %v547_v1, %v546_v0 }
 0x168   : > { %657 = vmatmul.bf16.gmra.mxu2 %v559_v2 }
 0x169   : > { %v520_v3 = vpop.f32.mrf.mxu1 }
 0x16a   : > { %v521_v4 = vadd.f32 %v1772_v40, %v520_v3 }
 0x16c   : > { %v548_v7 = vmax.f32 %v521_v4, 0.0 }
 0x171   : > { %v522_v5 = vpop.f32.mrf.mxu1 }
 0x172   : > { %v523_v6 = vadd.f32 %v1772_v40, %v522_v5 }
 0x174   : > { %v549_v8 = vmax.f32 %v523_v6, 0.0 }
 0x176   : > { %v560_v9 = vpack.c.bf16 %v549_v8, %v548_v7 }
 0x178   : > { %662 = vmatmul.bf16.gmra.mxu2 %v560_v9 }
 0x179   : > { %v525_v10 = vpop.f32.mrf.mxu1 }
 0x17a   : > { %v526_v11 = vadd.f32 %v1772_v40, %v525_v10 }
 0x17c   : > { %v550_v14 = vmax.f32 %v526_v11, 0.0 }
 0x181   : > { %v527_v12 = vpop.f32.mrf.mxu1 }
 0x182   : > { %v528_v13 = vadd.f32 %v1772_v40, %v527_v12 }
 0x184   : > { %v551_v15 = vmax.f32 %v528_v13, 0.0 }
 0x186   : > { %v561_v16 = vpack.c.bf16 %v551_v15, %v550_v14 }
 0x188   : > { %667 = vmatmul.bf16.gmra.mxu2 %v561_v16 }
 0x189   : > { %v530_v18 = vpop.f32.mrf.mxu1 }
 0x18a   : > { %v531_v21 = vadd.f32 %v1772_v40, %v530_v18 }
 0x18c   : > { %v552_v25 = vmax.f32 %v531_v21, 0.0 }
 0x191   : > { %v532_v22 = vpop.f32.mrf.mxu1 }
 0x192   : > { %v533_v23 = vadd.f32 %v1772_v40, %v532_v22 }
 0x194   : > { %v553_v26 = vmax.f32 %v533_v23, 0.0 }
 0x196   : > { %v562_v27 = vpack.c.bf16 %v553_v26, %v552_v25 }
 0x198   : > { %672 = vmatmul.bf16.gmra.mxu2 %v562_v27 }
 0x199   : > { %v535_v28 = vpop.f32.mrf.mxu1 }
 0x19a   : > { %v536_v31 = vadd.f32 %v1772_v40, %v535_v28 }
 0x19c   : > { %v554_v35 = vmax.f32 %v536_v31, 0.0 }
 0x1a1   : > { %v537_v32 = vpop.f32.mrf.mxu1 }
 0x1a2   : > { %v538_v34 = vadd.f32 %v1772_v40, %v537_v32  ;;  %v1820_v32 = vld [vmem:[%s1899_s6] ss:$0 sm:$0xff] }
 0x1a4   : > { %v555_v36 = vmax.f32 %v538_v34, 0.0 }
 0x1a6   : > { %v563_v39 = vpack.c.bf16 %v555_v36, %v554_v35 }
 0x1a8   : > { %677 = vmatmul.bf16.gmra.mxu2 %v563_v39 }
 0x1bb   : > { %v643_v41 = vpop.f32.mrf.mxu2 }
 0x1bc   : > { %v644_v43 = vadd.f32 %v1444_v42, %v643_v41 }
 0x1be   : > { %v683_v46 = vmax.f32 %v644_v43, 0.0 }
 0x1c3   : > { %v645_v44 = vpop.f32.mrf.mxu2 }
 0x1c4   : > { %v646_v45 = vadd.f32 %v1444_v42, %v645_v44 }
 0x1c6   : > { %v684_v40 = vmax.f32 %v646_v45, 0.0 }
 0x1c8   : > { %v699_v38 = vpack.c.bf16 %v684_v40, %v683_v46 }
 0x1ca   : > { %783 = vmatmul.bf16.vlgmr.msra.gmra.mxu3 %v699_v38 }
 0x1cb   : > { %v648_v47 = vpop.f32.mrf.mxu2 }
 0x1cc   : > { %v649_v48 = vadd.f32 %v1444_v42, %v648_v47 }
 0x1ce   : > { %v685_v51 = vmax.f32 %v649_v48, 0.0 }
 0x1d3   : > { %v650_v49 = vpop.f32.mrf.mxu2 }
 0x1d4   : > { %v651_v50 = vadd.f32 %v1444_v42, %v650_v49 }
 0x1d6   : > { %v686_v52 = vmax.f32 %v651_v50, 0.0 }
 0x1d8   : > { %v700_v53 = vpack.c.bf16 %v686_v52, %v685_v51 }
 0x1da   : > { %788 = vmatmul.bf16.gmra.mxu3 %v700_v53 }
 0x1db   : > { %v653_v54 = vpop.f32.mrf.mxu2 }
 0x1dc   : > { %v654_v55 = vadd.f32 %v1444_v42, %v653_v54 }
 0x1de   : > { %v687_v58 = vmax.f32 %v654_v55, 0.0 }
 0x1e3   : > { %v655_v56 = vpop.f32.mrf.mxu2 }
 0x1e4   : > { %v656_v57 = vadd.f32 %v1444_v42, %v655_v56 }
 0x1e6   : > { %v688_v59 = vmax.f32 %v656_v57, 0.0 }
 0x1e8   : > { %v701_v60 = vpack.c.bf16 %v688_v59, %v687_v58 }
 0x1ea   : > { %793 = vmatmul.bf16.gmra.mxu3 %v701_v60 }
 0x1eb   : > { %v658_v61 = vpop.f32.mrf.mxu2 }
 0x1ec   : > { %v659_v62 = vadd.f32 %v1444_v42, %v658_v61 }
 0x1ee   : > { %v689_v1 = vmax.f32 %v659_v62, 0.0 }
 0x1f3   : > { %v660_v63 = vpop.f32.mrf.mxu2 }
 0x1f4   : > { %v661_v0 = vadd.f32 %v1444_v42, %v660_v63 }
 0x1f6   : > { %v690_v2 = vmax.f32 %v661_v0, 0.0 }
 0x1f8   : > { %v702_v3 = vpack.c.bf16 %v690_v2, %v689_v1 }
 0x1fa   : > { %798 = vmatmul.bf16.gmra.mxu3 %v702_v3 }
 0x1fb   : > { %v663_v4 = vpop.f32.mrf.mxu2 }
 0x1fc   : > { %v664_v5 = vadd.f32 %v1444_v42, %v663_v4 }
 0x1fe   : > { %v691_v8 = vmax.f32 %v664_v5, 0.0 }
 0x203   : > { %v665_v6 = vpop.f32.mrf.mxu2 }
 0x204   : > { %v666_v7 = vadd.f32 %v1444_v42, %v665_v6 }
 0x206   : > { %v692_v9 = vmax.f32 %v666_v7, 0.0 }
 0x208   : > { %v703_v10 = vpack.c.bf16 %v692_v9, %v691_v8 }
 0x20a   : > { %803 = vmatmul.bf16.gmra.mxu3 %v703_v10 }
 0x20b   : > { %v668_v11 = vpop.f32.mrf.mxu2 }
 0x20c   : > { %v669_v12 = vadd.f32 %v1444_v42, %v668_v11 }
 0x20e   : > { %v693_v15 = vmax.f32 %v669_v12, 0.0 }
 0x213   : > { %v670_v13 = vpop.f32.mrf.mxu2 }
 0x214   : > { %v671_v14 = vadd.f32 %v1444_v42, %v670_v13 }
 0x216   : > { %v694_v16 = vmax.f32 %v671_v14, 0.0 }
 0x218   : > { %v704_v17 = vpack.c.bf16 %v694_v16, %v693_v15 }
 0x21a   : > { %808 = vmatmul.bf16.gmra.mxu3 %v704_v17 }
 0x21b   : > { %v673_v18 = vpop.f32.mrf.mxu2 }
 0x21c   : > { %v674_v19 = vadd.f32 %v1444_v42, %v673_v18 }
 0x21e   : > { %v695_v22 = vmax.f32 %v674_v19, 0.0 }
 0x223   : > { %v675_v20 = vpop.f32.mrf.mxu2 }
 0x224   : > { %v676_v21 = vadd.f32 %v1444_v42, %v675_v20 }
 0x226   : > { %v696_v23 = vmax.f32 %v676_v21, 0.0 }
 0x228   : > { %v705_v24 = vpack.c.bf16 %v696_v23, %v695_v22 }
 0x22a   : > { %813 = vmatmul.bf16.gmra.mxu3 %v705_v24 }
 0x22b   : > { %v678_v25 = vpop.f32.mrf.mxu2 }
 0x22c   : > { %v679_v26 = vadd.f32 %v1444_v42, %v678_v25 }
 0x22e   : > { %v697_v29 = vmax.f32 %v679_v26, 0.0 }
 0x233   : > { %v680_v27 = vpop.f32.mrf.mxu2 }
 0x234   : > { %v681_v28 = vadd.f32 %v1444_v42, %v680_v27 }
 0x236   : > { %v698_v30 = vmax.f32 %v681_v28, 0.0 }
 0x238   : > { %v706_v31 = vpack.c.bf16 %v698_v30, %v697_v29 }
 0x23a   : > { %818 = vmatmul.bf16.gmra.mxu3 %v706_v31 }
 0x24d   : > { %v784_v33 = vpop.f32.mrf.mxu3 }
 0x24e   : > { %v785_v34 = vadd.f32 %v1820_v32, %v784_v33 }
 0x250   : > { %v1354_v35 = vmul.f32 -1.442695, %v785_v34 }
 0x252   : > { %1446 = vpow2.f32 %v1354_v35 }
 0x255   : > { %v786_v36 = vpop.f32.mrf.mxu3 }
 0x256   : > { %v787_v37 = vadd.f32 %v1820_v32, %v786_v36 }
 0x258   : > { %v1447_v39 = vpop.eup %1446  ;;  %v1355_v41 = vmul.f32 -1.442695, %v787_v37 }
 0x259   : > { %v872_v42 = vadd.f32 1.0, %v1447_v39 }
 0x25a   : > { %1448 = vpow2.f32 %v1355_v41 }
 0x25b   : > { %1450 = vrcp.f32 %v872_v42  ;;  %v899_v49 = vand.u32 2147483648, %v872_v42  ;;  %v897_v52 = vand.u32 2147483647, %v872_v42  ;;  %vm893_vm3 = vweird.f32 %v872_v42 }
 0x25d   : > { %v789_v43 = vpop.f32.mrf.mxu3  ;;  %v900_v58 = vor.u32 1.1754944e-38, %v899_v49  ;;  %vm898_vm5 = vcmp.eq.f32.partialorder %v897_v52, 8.507059e+37 }
 0x25e   : > { %v790_v44 = vadd.f32 %v1820_v32, %v789_v43 }
 0x260   : > { %v1449_v45 = vpop.eup %1448  ;;  %v1356_v46 = vmul.f32 -1.442695, %v790_v44 }
 0x261   : > { %v1451_v40 = vpop.eup %1450  ;;  %v873_v38 = vadd.f32 1.0, %v1449_v45 }
 0x262   : > { %v889_v47 = vmul.f32 %v1451_v40, %v872_v42  ;;  %1452 = vpow2.f32 %v1356_v46  ;;  %vm894_vm2 = vweird.f32 %v1451_v40 }
 0x263   : > { %1454 = vrcp.f32 %v873_v38  ;;  %vm895_vm4 = vmor %vm893_vm3, %vm894_vm2  ;;  %v914_v0 = vand.u32 2147483648, %v873_v38  ;;  %v912_v3 = vand.u32 2147483647, %v873_v38  ;;  %vm908_vm7 = vweird.f32 %v873_v38 }
 0x264   : > { %v890_v48 = vsub.f32 1.0, %v889_v47 }
 0x265   : > { %v791_v50 = vpop.f32.mrf.mxu3  ;;  %v915_v9 = vor.u32 1.1754944e-38, %v914_v0  ;;  %vm913_vm9 = vcmp.eq.f32.partialorder %v912_v3, 8.507059e+37 }
 0x266   : > { %v891_v51 = vmul.f32 %v1451_v40, %v890_v48  ;;  %v792_v53 = vadd.f32 %v1820_v32, %v791_v50 }
 0x268   : > { %v1453_v54 = vpop.eup %1452  ;;  %v892_v55 = vadd.f32 %v1451_v40, %v891_v51  ;;  %v1357_v56 = vmul.f32 -1.442695, %v792_v53 }
 0x269   : > { %v1455_v57 = vpop.eup %1454  ;;  %v874_v59 = vadd.f32 1.0, %v1453_v54 }
 0x26a   : > { %v896_v60 = vsel %vm895_vm4, %v1451_v40, %v892_v55  ;;  %v904_v61 = vmul.f32 %v1455_v57, %v873_v38  ;;  %1456 = vpow2.f32 %v1357_v56  ;;  %vm909_vm6 = vweird.f32 %v1455_v57 }
 0x26b   : > { %v901_v62 = vsel %vm898_vm5, %v900_v58, %v896_v60  ;;  %1458 = vrcp.f32 %v874_v59  ;;  %vm910_vm8 = vmor %vm908_vm7, %vm909_vm6  ;;  %v929_v15 = vand.u32 2147483648, %v874_v59  ;;  %v927_v18 = vand.u32 2147483647, %v874_v59 }
 0x26c   : > { %1128 = vst [vmem:[%s1829_s8] sm:$0xff] %v901_v62  ;;  %v905_v63 = vsub.f32 1.0, %v904_v61  ;;  %vm923_vm11 = vweird.f32 %v874_v59 }
 0x26d   : > { %v794_v1 = vpop.f32.mrf.mxu3  ;;  %v930_v24 = vor.u32 1.1754944e-38, %v929_v15  ;;  %vm928_vm13 = vcmp.eq.f32.partialorder %v927_v18, 8.507059e+37 }
 0x26e   : > { %v906_v2 = vmul.f32 %v1455_v57, %v905_v63  ;;  %v795_v4 = vadd.f32 %v1820_v32, %v794_v1 }
 0x270   : > { %v1457_v5 = vpop.eup %1456  ;;  %v907_v6 = vadd.f32 %v1455_v57, %v906_v2  ;;  %v1358_v7 = vmul.f32 -1.442695, %v795_v4 }
 0x271   : > { %v1459_v8 = vpop.eup %1458  ;;  %v875_v10 = vadd.f32 1.0, %v1457_v5 }
 0x272   : > { %v911_v11 = vsel %vm910_vm8, %v1455_v57, %v907_v6  ;;  %v919_v12 = vmul.f32 %v1459_v8, %v874_v59  ;;  %1460 = vpow2.f32 %v1358_v7  ;;  %vm924_vm10 = vweird.f32 %v1459_v8 }
 0x273   : > { %v916_v13 = vsel %vm913_vm9, %v915_v9, %v911_v11  ;;  %1462 = vrcp.f32 %v875_v10  ;;  %vm925_vm12 = vmor %vm923_vm11, %vm924_vm10  ;;  %v944_v30 = vand.u32 2147483648, %v875_v10  ;;  %v942_v34 = vand.u32 2147483647, %v875_v10 }
 0x274   : > { %1129 = vst [vmem:[%s1829_s8 + $0x8] sm:$0xff] %v916_v13  ;;  %v920_v14 = vsub.f32 1.0, %v919_v12  ;;  %vm938_vm15 = vweird.f32 %v875_v10 }
 0x275   : > { %v796_v16 = vpop.f32.mrf.mxu3  ;;  %v945_v42 = vor.u32 1.1754944e-38, %v944_v30  ;;  %vm943_vm1 = vcmp.eq.f32.partialorder %v942_v34, 8.507059e+37 }
 0x276   : > { %v921_v17 = vmul.f32 %v1459_v8, %v920_v14  ;;  %v797_v19 = vadd.f32 %v1820_v32, %v796_v16 }
 0x278   : > { %v1461_v20 = vpop.eup %1460  ;;  %v922_v21 = vadd.f32 %v1459_v8, %v921_v17  ;;  %v1359_v22 = vmul.f32 -1.442695, %v797_v19 }
 0x279   : > { %v1463_v23 = vpop.eup %1462  ;;  %v876_v25 = vadd.f32 1.0, %v1461_v20 }
 0x27a   : > { %v926_v26 = vsel %vm925_vm12, %v1459_v8, %v922_v21  ;;  %v934_v27 = vmul.f32 %v1463_v23, %v875_v10  ;;  %1464 = vpow2.f32 %v1359_v22  ;;  %vm939_vm14 = vweird.f32 %v1463_v23 }
 0x27b   : > { %v931_v28 = vsel %vm928_vm13, %v930_v24, %v926_v26  ;;  %1466 = vrcp.f32 %v876_v25  ;;  %vm940_vm0 = vmor %vm938_vm15, %vm939_vm14  ;;  %v959_v38 = vand.u32 2147483648, %v876_v25  ;;  %v957_v49 = vand.u32 2147483647, %v876_v25 }
 0x27c   : > { %1130 = vst [vmem:[%s1829_s8 + $0x10] sm:$0xff] %v931_v28  ;;  %v935_v29 = vsub.f32 1.0, %v934_v27  ;;  %vm953_vm3 = vweird.f32 %v876_v25 }
 0x27d   : > { %v799_v31 = vpop.f32.mrf.mxu3  ;;  %v960_v55 = vor.u32 1.1754944e-38, %v959_v38  ;;  %vm958_vm5 = vcmp.eq.f32.partialorder %v957_v49, 8.507059e+37 }
 0x27e   : > { %v936_v33 = vmul.f32 %v1463_v23, %v935_v29  ;;  %v800_v35 = vadd.f32 %v1820_v32, %v799_v31 }
 0x280   : > { %v1465_v36 = vpop.eup %1464  ;;  %v937_v37 = vadd.f32 %v1463_v23, %v936_v33  ;;  %v1360_v39 = vmul.f32 -1.442695, %v800_v35 }
 0x281   : > { %v1467_v41 = vpop.eup %1466  ;;  %v877_v43 = vadd.f32 1.0, %v1465_v36 }
 0x282   : > { %v941_v44 = vsel %vm940_vm0, %v1463_v23, %v937_v37  ;;  %v949_v45 = vmul.f32 %v1467_v41, %v876_v25  ;;  %1468 = vpow2.f32 %v1360_v39  ;;  %vm954_vm2 = vweird.f32 %v1467_v41 }
 0x283   : > { %v946_v46 = vsel %vm943_vm1, %v945_v42, %v941_v44  ;;  %1470 = vrcp.f32 %v877_v43  ;;  %vm955_vm4 = vmor %vm953_vm3, %vm954_vm2  ;;  %v974_v61 = vand.u32 2147483648, %v877_v43  ;;  %v972_v0 = vand.u32 2147483647, %v877_v43 }
 0x284   : > { %1131 = vst [vmem:[%s1829_s8 + $0x18] sm:$0xff] %v946_v46  ;;  %v950_v40 = vsub.f32 1.0, %v949_v45  ;;  %vm968_vm7 = vweird.f32 %v877_v43 }
 0x285   : > { %v801_v47 = vpop.f32.mrf.mxu3  ;;  %v975_v6 = vor.u32 1.1754944e-38, %v974_v61  ;;  %vm973_vm9 = vcmp.eq.f32.partialorder %v972_v0, 8.507059e+37 }
 0x286   : > { %v951_v48 = vmul.f32 %v1467_v41, %v950_v40  ;;  %v802_v50 = vadd.f32 %v1820_v32, %v801_v47 }
 0x288   : > { %v1469_v51 = vpop.eup %1468  ;;  %v952_v52 = vadd.f32 %v1467_v41, %v951_v48  ;;  %v1361_v53 = vmul.f32 -1.442695, %v802_v50 }
 0x289   : > { %v1471_v54 = vpop.eup %1470  ;;  %v878_v56 = vadd.f32 1.0, %v1469_v51 }
 0x28a   : > { %v956_v57 = vsel %vm955_vm4, %v1467_v41, %v952_v52  ;;  %v964_v58 = vmul.f32 %v1471_v54, %v877_v43  ;;  %1472 = vpow2.f32 %v1361_v53  ;;  %vm969_vm6 = vweird.f32 %v1471_v54 }
 0x28b   : > { %v961_v59 = vsel %vm958_vm5, %v960_v55, %v956_v57  ;;  %1474 = vrcp.f32 %v878_v56  ;;  %vm970_vm8 = vmor %vm968_vm7, %vm969_vm6  ;;  %v989_v12 = vand.u32 2147483648, %v878_v56  ;;  %v987_v15 = vand.u32 2147483647, %v878_v56 }
 0x28c   : > { %1132 = vst [vmem:[%s1829_s8 + $0x20] sm:$0xff] %v961_v59  ;;  %v965_v60 = vsub.f32 1.0, %v964_v58  ;;  %vm983_vm11 = vweird.f32 %v878_v56 }
 0x28d   : > { %v804_v62 = vpop.f32.mrf.mxu3  ;;  %v990_v21 = vor.u32 1.1754944e-38, %v989_v12  ;;  %vm988_vm13 = vcmp.eq.f32.partialorder %v987_v15, 8.507059e+37 }
 0x28e   : > { %v966_v63 = vmul.f32 %v1471_v54, %v965_v60  ;;  %v805_v1 = vadd.f32 %v1820_v32, %v804_v62 }
 0x290   : > { %v1473_v2 = vpop.eup %1472  ;;  %v967_v3 = vadd.f32 %v1471_v54, %v966_v63  ;;  %v1362_v4 = vmul.f32 -1.442695, %v805_v1 }
 0x291   : > { %v1475_v5 = vpop.eup %1474  ;;  %v879_v7 = vadd.f32 1.0, %v1473_v2 }
 0x292   : > { %v971_v8 = vsel %vm970_vm8, %v1471_v54, %v967_v3  ;;  %v979_v9 = vmul.f32 %v1475_v5, %v878_v56  ;;  %1476 = vpow2.f32 %v1362_v4  ;;  %vm984_vm10 = vweird.f32 %v1475_v5 }
 0x293   : > { %v976_v10 = vsel %vm973_vm9, %v975_v6, %v971_v8  ;;  %1478 = vrcp.f32 %v879_v7  ;;  %vm985_vm12 = vmor %vm983_vm11, %vm984_vm10  ;;  %v1004_v27 = vand.u32 2147483648, %v879_v7  ;;  %v1002_v30 = vand.u32 2147483647, %v879_v7 }
 0x294   : > { %1133 = vst [vmem:[%s1829_s8 + $0x28] sm:$0xff] %v976_v10  ;;  %v980_v11 = vsub.f32 1.0, %v979_v9  ;;  %vm998_vm15 = vweird.f32 %v879_v7 }
 0x295   : > { %v806_v13 = vpop.f32.mrf.mxu3  ;;  %v1005_v37 = vor.u32 1.1754944e-38, %v1004_v27  ;;  %vm1003_vm1 = vcmp.eq.f32.partialorder %v1002_v30, 8.507059e+37 }
 0x296   : > { %v981_v14 = vmul.f32 %v1475_v5, %v980_v11  ;;  %v807_v16 = vadd.f32 %v1820_v32, %v806_v13 }
 0x298   : > { %v1477_v17 = vpop.eup %1476  ;;  %v982_v18 = vadd.f32 %v1475_v5, %v981_v14  ;;  %v1363_v19 = vmul.f32 -1.442695, %v807_v16 }
 0x299   : > { %v1479_v20 = vpop.eup %1478  ;;  %v880_v22 = vadd.f32 1.0, %v1477_v17 }
 0x29a   : > { %v986_v23 = vsel %vm985_vm12, %v1475_v5, %v982_v18  ;;  %v994_v24 = vmul.f32 %v1479_v20, %v879_v7  ;;  %1480 = vpow2.f32 %v1363_v19  ;;  %vm999_vm14 = vweird.f32 %v1479_v20 }
 0x29b   : > { %v991_v25 = vsel %vm988_vm13, %v990_v21, %v986_v23  ;;  %1482 = vrcp.f32 %v880_v22  ;;  %vm1000_vm0 = vmor %vm998_vm15, %vm999_vm14  ;;  %v1019_v45 = vand.u32 2147483648, %v880_v22  ;;  %v1017_v38 = vand.u32 2147483647, %v880_v22 }
 0x29c   : > { %1134 = vst [vmem:[%s1829_s8 + $0x30] sm:$0xff] %v991_v25  ;;  %v995_v26 = vsub.f32 1.0, %v994_v24  ;;  %vm1013_vm3 = vweird.f32 %v880_v22 }
 0x29d   : > { %v809_v28 = vpop.f32.mrf.mxu3  ;;  %v1020_v52 = vor.u32 1.1754944e-38, %v1019_v45  ;;  %vm1018_vm5 = vcmp.eq.f32.partialorder %v1017_v38, 8.507059e+37 }
 0x29e   : > { %v996_v29 = vmul.f32 %v1479_v20, %v995_v26  ;;  %v810_v31 = vadd.f32 %v1820_v32, %v809_v28 }
 0x2a0   : > { %v1481_v33 = vpop.eup %1480  ;;  %v997_v34 = vadd.f32 %v1479_v20, %v996_v29  ;;  %v1364_v35 = vmul.f32 -1.442695, %v810_v31 }
 0x2a1   : > { %v1483_v36 = vpop.eup %1482  ;;  %v881_v39 = vadd.f32 1.0, %v1481_v33 }
 0x2a2   : > { %v1001_v41 = vsel %vm1000_vm0, %v1479_v20, %v997_v34  ;;  %v1009_v42 = vmul.f32 %v1483_v36, %v880_v22  ;;  %1484 = vpow2.f32 %v1364_v35  ;;  %vm1014_vm2 = vweird.f32 %v1483_v36 }
 0x2a3   : > { %v1006_v43 = vsel %vm1003_vm1, %v1005_v37, %v1001_v41  ;;  %1486 = vrcp.f32 %v881_v39  ;;  %vm1015_vm4 = vmor %vm1013_vm3, %vm1014_vm2  ;;  %v1034_v58 = vand.u32 2147483648, %v881_v39  ;;  %v1032_v61 = vand.u32 2147483647, %v881_v39 }
 0x2a4   : > { %1135 = vst [vmem:[%s1829_s8 + $0x38] sm:$0xff] %v1006_v43  ;;  %v1010_v44 = vsub.f32 1.0, %v1009_v42  ;;  %vm1028_vm7 = vweird.f32 %v881_v39 }
 0x2a5   : > { %v811_v46 = vpop.f32.mrf.mxu3  ;;  %v1035_v3 = vor.u32 1.1754944e-38, %v1034_v58  ;;  %vm1033_vm9 = vcmp.eq.f32.partialorder %v1032_v61, 8.507059e+37 }
 0x2a6   : > { %v1011_v40 = vmul.f32 %v1483_v36, %v1010_v44  ;;  %v812_v47 = vadd.f32 %v1820_v32, %v811_v46 }
 0x2a8   : > { %v1485_v48 = vpop.eup %1484  ;;  %v1012_v49 = vadd.f32 %v1483_v36, %v1011_v40  ;;  %v1365_v50 = vmul.f32 -1.442695, %v812_v47 }
 0x2a9   : > { %v1487_v51 = vpop.eup %1486  ;;  %v882_v53 = vadd.f32 1.0, %v1485_v48 }
 0x2aa   : > { %v1016_v54 = vsel %vm1015_vm4, %v1483_v36, %v1012_v49  ;;  %v1024_v55 = vmul.f32 %v1487_v51, %v881_v39  ;;  %1488 = vpow2.f32 %v1365_v50  ;;  %vm1029_vm6 = vweird.f32 %v1487_v51 }
 0x2ab   : > { %v1021_v56 = vsel %vm1018_vm5, %v1020_v52, %v1016_v54  ;;  %1490 = vrcp.f32 %v882_v53  ;;  %vm1030_vm8 = vmor %vm1028_vm7, %vm1029_vm6  ;;  %v1049_v9 = vand.u32 2147483648, %v882_v53  ;;  %v1047_v12 = vand.u32 2147483647, %v882_v53 }
 0x2ac   : > { %1136 = vst [vmem:[%s1829_s8 + $0x40] sm:$0xff] %v1021_v56  ;;  %v1025_v57 = vsub.f32 1.0, %v1024_v55  ;;  %vm1043_vm11 = vweird.f32 %v882_v53 }
 0x2ad   : > { %v814_v59 = vpop.f32.mrf.mxu3  ;;  %v1050_v18 = vor.u32 1.1754944e-38, %v1049_v9  ;;  %vm1048_vm13 = vcmp.eq.f32.partialorder %v1047_v12, 8.507059e+37 }
 0x2ae   : > { %v1026_v60 = vmul.f32 %v1487_v51, %v1025_v57  ;;  %v815_v62 = vadd.f32 %v1820_v32, %v814_v59 }
 0x2b0   : > { %v1489_v63 = vpop.eup %1488  ;;  %v1027_v0 = vadd.f32 %v1487_v51, %v1026_v60  ;;  %v1366_v1 = vmul.f32 -1.442695, %v815_v62 }
 0x2b1   : > { %v1491_v2 = vpop.eup %1490  ;;  %v883_v4 = vadd.f32 1.0, %v1489_v63 }
 0x2b2   : > { %v1031_v5 = vsel %vm1030_vm8, %v1487_v51, %v1027_v0  ;;  %v1039_v6 = vmul.f32 %v1491_v2, %v882_v53  ;;  %1492 = vpow2.f32 %v1366_v1  ;;  %vm1044_vm10 = vweird.f32 %v1491_v2 }
 0x2b3   : > { %v1036_v7 = vsel %vm1033_vm9, %v1035_v3, %v1031_v5  ;;  %1494 = vrcp.f32 %v883_v4  ;;  %vm1045_vm12 = vmor %vm1043_vm11, %vm1044_vm10  ;;  %v1064_v24 = vand.u32 2147483648, %v883_v4  ;;  %v1062_v27 = vand.u32 2147483647, %v883_v4 }
 0x2b4   : > { %1137 = vst [vmem:[%s1829_s8 + $0x48] sm:$0xff] %v1036_v7  ;;  %v1040_v8 = vsub.f32 1.0, %v1039_v6  ;;  %vm1058_vm15 = vweird.f32 %v883_v4 }
 0x2b5   : > { %v816_v10 = vpop.f32.mrf.mxu3  ;;  %v1065_v34 = vor.u32 1.1754944e-38, %v1064_v24  ;;  %vm1063_vm1 = vcmp.eq.f32.partialorder %v1062_v27, 8.507059e+37 }
 0x2b6   : > { %v1041_v11 = vmul.f32 %v1491_v2, %v1040_v8  ;;  %v817_v13 = vadd.f32 %v1820_v32, %v816_v10 }
 0x2b8   : > { %v1493_v14 = vpop.eup %1492  ;;  %v1042_v15 = vadd.f32 %v1491_v2, %v1041_v11  ;;  %v1367_v16 = vmul.f32 -1.442695, %v817_v13 }
 0x2b9   : > { %v1495_v17 = vpop.eup %1494  ;;  %v884_v19 = vadd.f32 1.0, %v1493_v14 }
 0x2ba   : > { %v1046_v20 = vsel %vm1045_vm12, %v1491_v2, %v1042_v15  ;;  %v1054_v21 = vmul.f32 %v1495_v17, %v883_v4  ;;  %1496 = vpow2.f32 %v1367_v16  ;;  %vm1059_vm14 = vweird.f32 %v1495_v17 }
 0x2bb   : > { %v1051_v22 = vsel %vm1048_vm13, %v1050_v18, %v1046_v20  ;;  %1498 = vrcp.f32 %v884_v19  ;;  %vm1060_vm0 = vmor %vm1058_vm15, %vm1059_vm14  ;;  %v1079_v42 = vand.u32 2147483648, %v884_v19  ;;  %v1077_v45 = vand.u32 2147483647, %v884_v19 }
 0x2bc   : > { %1138 = vst [vmem:[%s1829_s8 + $0x50] sm:$0xff] %v1051_v22  ;;  %v1055_v23 = vsub.f32 1.0, %v1054_v21  ;;  %vm1073_vm3 = vweird.f32 %v884_v19 }
 0x2bd   : > { %v819_v25 = vpop.f32.mrf.mxu3  ;;  %v1080_v49 = vor.u32 1.1754944e-38, %v1079_v42  ;;  %vm1078_vm5 = vcmp.eq.f32.partialorder %v1077_v45, 8.507059e+37 }
 0x2be   : > { %v1056_v26 = vmul.f32 %v1495_v17, %v1055_v23  ;;  %v820_v28 = vadd.f32 %v1820_v32, %v819_v25 }
 0x2c0   : > { %v1497_v29 = vpop.eup %1496  ;;  %v1057_v30 = vadd.f32 %v1495_v17, %v1056_v26  ;;  %v1368_v31 = vmul.f32 -1.442695, %v820_v28 }
 0x2c1   : > { %v1499_v33 = vpop.eup %1498  ;;  %v885_v35 = vadd.f32 1.0, %v1497_v29 }
 0x2c2   : > { %v1061_v36 = vsel %vm1060_vm0, %v1495_v17, %v1057_v30  ;;  %v1069_v37 = vmul.f32 %v1499_v33, %v884_v19  ;;  %1500 = vpow2.f32 %v1368_v31  ;;  %vm1074_vm2 = vweird.f32 %v1499_v33 }
 0x2c3   : > { %v1066_v39 = vsel %vm1063_vm1, %v1065_v34, %v1061_v36  ;;  %1502 = vrcp.f32 %v885_v35  ;;  %vm1075_vm4 = vmor %vm1073_vm3, %vm1074_vm2  ;;  %v1094_v55 = vand.u32 2147483648, %v885_v35  ;;  %vm1088_vm7 = vweird.f32 %v885_v35 }
 0x2c4   : > { %1139 = vst [vmem:[%s1829_s8 + $0x58] sm:$0xff] %v1066_v39  ;;  %v1070_v41 = vsub.f32 1.0, %v1069_v37 }
 0x2c5   : > { %v821_v43 = vpop.f32.mrf.mxu3  ;;  %v1095_v60 = vor.u32 1.1754944e-38, %v1094_v55 }
 0x2c6   : > { %v1071_v44 = vmul.f32 %v1499_v33, %v1070_v41  ;;  %v822_v46 = vadd.f32 %v1820_v32, %v821_v43  ;;  %v1092_v32 = vand.u32 2147483647, %v885_v35 }
 0x2c8   : > { %v1501_v40 = vpop.eup %1500  ;;  %v1072_v38 = vadd.f32 %v1499_v33, %v1071_v44  ;;  %v1369_v47 = vmul.f32 -1.442695, %v822_v46  ;;  %vm1093_vm9 = vcmp.eq.f32.partialorder %v1092_v32, 8.507059e+37 }
 0x2c9   : > { %v1503_v48 = vpop.eup %1502  ;;  %v886_v50 = vadd.f32 1.0, %v1501_v40 }
 0x2ca   : > { %v1076_v51 = vsel %vm1075_vm4, %v1499_v33, %v1072_v38  ;;  %v1084_v52 = vmul.f32 %v1503_v48, %v885_v35  ;;  %1504 = vpow2.f32 %v1369_v47  ;;  %vm1089_vm6 = vweird.f32 %v1503_v48 }
 0x2cb   : > { %v1081_v53 = vsel %vm1078_vm5, %v1080_v49, %v1076_v51  ;;  %1506 = vrcp.f32 %v886_v50  ;;  %vm1090_vm8 = vmor %vm1088_vm7, %vm1089_vm6  ;;  %v1109_v2 = vand.u32 2147483648, %v886_v50  ;;  %v1107_v4 = vand.u32 2147483647, %v886_v50 }
 0x2cc   : > { %1140 = vst [vmem:[%s1829_s8 + $0x60] sm:$0xff] %v1081_v53  ;;  %v1085_v54 = vsub.f32 1.0, %v1084_v52  ;;  %vm1103_vm11 = vweird.f32 %v886_v50 }
 0x2cd   : > { %v1110_v7 = vor.u32 1.1754944e-38, %v1109_v2  ;;  %vm1108_vm13 = vcmp.eq.f32.partialorder %v1107_v4, 8.507059e+37 }
 0x2ce   : > { %v1086_v56 = vmul.f32 %v1503_v48, %v1085_v54 }
 0x2d0   : > { %v1505_v57 = vpop.eup %1504  ;;  %v1087_v58 = vadd.f32 %v1503_v48, %v1086_v56 }
 0x2d1   : > { %v1507_v59 = vpop.eup %1506  ;;  %v887_v61 = vadd.f32 1.0, %v1505_v57 }
 0x2d2   : > { %v1091_v62 = vsel %vm1090_vm8, %v1503_v48, %v1087_v58  ;;  %v1099_v63 = vmul.f32 %v1507_v59, %v886_v50  ;;  %vm1104_vm10 = vweird.f32 %v1507_v59 }
 0x2d3   : > { %v1096_v0 = vsel %vm1093_vm9, %v1095_v60, %v1091_v62  ;;  %1508 = vrcp.f32 %v887_v61  ;;  %vm1105_vm12 = vmor %vm1103_vm11, %vm1104_vm10  ;;  %v1124_v12 = vand.u32 2147483648, %v887_v61  ;;  %v1122_v14 = vand.u32 2147483647, %v887_v61 }
 0x2d4   : > { %1141 = vst [vmem:[%s1829_s8 + $0x68] sm:$0xff] %v1096_v0  ;;  %v1100_v1 = vsub.f32 1.0, %v1099_v63  ;;  %vm1118_vm15 = vweird.f32 %v887_v61 }
 0x2d5   : > { %v1125_v16 = vor.u32 1.1754944e-38, %v1124_v12  ;;  %vm1123_vm1 = vcmp.eq.f32.partialorder %v1122_v14, 8.507059e+37 }
 0x2d6   : > { %v1101_v3 = vmul.f32 %v1507_v59, %v1100_v1 }
 0x2d8   : > { %v1102_v5 = vadd.f32 %v1507_v59, %v1101_v3 }
 0x2d9   : > { %v1509_v6 = vpop.eup %1508 }
 0x2da   : > { %v1106_v8 = vsel %vm1105_vm12, %v1507_v59, %v1102_v5  ;;  %v1114_v9 = vmul.f32 %v1509_v6, %v887_v61  ;;  %vm1119_vm14 = vweird.f32 %v1509_v6 }
 0x2db   : > { %v1111_v10 = vsel %vm1108_vm13, %v1110_v7, %v1106_v8  ;;  %vm1120_vm0 = vmor %vm1118_vm15, %vm1119_vm14 }
 0x2dc   : > { %1142 = vst [vmem:[%s1829_s8 + $0x70] sm:$0xff] %v1111_v10  ;;  %v1115_v11 = vsub.f32 1.0, %v1114_v9 }
 0x2de   : > { %v1116_v13 = vmul.f32 %v1509_v6, %v1115_v11 }
 0x2e0   : > { %v1117_v15 = vadd.f32 %v1509_v6, %v1116_v13 }
 0x2e2   : > { %v1121_v17 = vsel %vm1120_vm0, %v1509_v6, %v1117_v15 }
 0x2e3   : > { %v1126_v18 = vsel %vm1123_vm1, %v1125_v16, %v1121_v17 }
 0x2e4   : > { %1143 = vst [vmem:[%s1829_s8 + $0x78] sm:$0xff] %v1126_v18 }
 0x2e5   : > { %1537 = shalt.err (!%p1534_p3)
}
 0x2e6   : > { %s1574_s23 = smov 128   ;;  %s1575_s8 = smov 8  }
 0x2e7   : > { %1401 = dma.vmem_to_hbm [thread:$0]  (%p1654_p5), %s1158_s28, 2048, %s1160_s15, %s1145_s16, %s1574_s23, %s1574_s23, %s1575_s8  }
 0x2e8 PF: > { %p1407_p4 = scmp.ge.s32.totalorder %s1572_s27, 2  ;;  %s1174_s21 = sand.u32 1, %s1560_s24  }
 0x2e9   : > { %s1175_s13 = scalar_lea.sflag [#allocation3], %s1174_s21 }
 0x2ea   : > { %p1404_p7 = pnand %p1407_p4, %p1658_p6 }
 0x2ec   : > { %p1405_p8 = pneg %p1404_p7 }
 0x2ee   : > { %1555 = dma.done.wait (%p1405_p8), %s1175_s13, 2048  }
 0x2ef   : > { %1557 = vsyncadd (%p1405_p8), %s1175_s13, 4294965248  ;;  %p17_p9 = scmp.ge.s32.totalorder %s1641_s30, 4   ;;  %s1903_s24 = smov %s1564_s25 }
 0x2f0   : > { %s1904_s25 = smov %s1568_s26  ;;  %s1905_s26 = smov %s1652_s10 }
 0x2f1   : > { %s1906_s27 = smov %s1641_s30  ;;  %19 = sbr.rel (!%p17_p9) target bundleno = 3 (0x3), region = 85 }
 0x2f6   :  { %1181 = vsyncpa [#allocation3], 1 }
 0x2f7   :  { %1183 = vsyncpa [#allocation3 + $0x1], 1 }

</bundles_post_ra>
